<compile_context>
chip_gen: v7x
topology: tpu7x:2x2x1
jax: 0.10.0
libtpu: 0.0.40
codegen_flags: <defaults>
</compile_context>

<pallas_src>
import functools
import math

import jax
import jax.numpy as jnp
from jax.experimental import pallas as pl
from jax.experimental.pallas import tpu as pltpu


def _attn_eraser_kernel(hs_ref, k_ref, v_ref,
                        wqt_ref, wot_ref, bo_ref,
                        wdt_ref, bd_ref, wut_ref, bu_ref,
                        out_ref,
                        q_sc, m_sc, l_sc, acc_sc,
                        *, num_heads, head_dim, scale):
    ki = pl.program_id(2)
    nk = pl.num_programs(2)
    H, Dh = num_heads, head_dim
    cdt = q_sc.dtype                      # MXU operand (compute) dtype
    f32 = jnp.float32

    # --- once per (batch, q-tile): project q (scale folded in), reset stats ---
    @pl.when(ki == 0)
    def _():
        hs = hs_ref[0].astype(cdt)                                 # (TQ, D)
        q = jnp.dot(hs, wqt_ref[...], preferred_element_type=f32)
        q_sc[...] = (q * scale).astype(cdt)
        m_sc[...] = jnp.full(m_sc.shape, -jnp.inf, dtype=m_sc.dtype)
        l_sc[...] = jnp.zeros(l_sc.shape, dtype=l_sc.dtype)
        acc_sc[...] = jnp.zeros(acc_sc.shape, dtype=acc_sc.dtype)

    # --- K/V for this key tile come pre-projected from the wrapper ---
    k = k_ref[0]                                                   # (TK, D) cdt
    v = v_ref[0]                                                   # (TK, D) cdt

    # --- online-softmax update, per head, into the (TQ, D) accumulator slab ---
    for h in range(H):
        lo = h * Dh
        qh = q_sc[:, lo:lo + Dh]                                   # (TQ, Dh)
        kh = k[:, lo:lo + Dh]                                      # (TK, Dh)
        vh = v[:, lo:lo + Dh]                                      # (TK, Dh)
        # NT form: contract head dims directly, no transpose op.
        s = jax.lax.dot_general(qh, kh, (((1,), (1,)), ((), ())),
                                preferred_element_type=f32)        # (TQ, TK)
        m_prev = m_sc[:, h:h + 1]                                  # (TQ, 1)
        m_new = jnp.maximum(m_prev, jnp.max(s, axis=-1, keepdims=True))
        alpha = jnp.exp(m_prev - m_new)
        p = jnp.exp(s - m_new)
        l_sc[:, h:h + 1] = alpha * l_sc[:, h:h + 1] + jnp.sum(p, axis=-1,
                                                              keepdims=True)
        acc_sc[:, lo:lo + Dh] = alpha * acc_sc[:, lo:lo + Dh] + jnp.dot(
            p.astype(cdt), vh, preferred_element_type=f32)
        m_sc[:, h:h + 1] = m_new

    # --- last key tile: normalize, single Wo matmul, adapter, residual ---
    @pl.when(ki == nk - 1)
    def _():
        for h in range(H):
            lo = h * Dh
            inv_l = pl.reciprocal(l_sc[:, h:h + 1], approx=True)   # (TQ, 1)
            acc_sc[:, lo:lo + Dh] = acc_sc[:, lo:lo + Dh] * inv_l
        ctx = acc_sc[...].astype(cdt)                              # (TQ, D) dense
        attn = jnp.dot(ctx, wot_ref[...],
                       preferred_element_type=f32) + bo_ref[...]   # (TQ, D) f32
        # to_out[1] Dropout is identity in eval.

        # AdapterEraser: up(GELU(down(x))); rank padded to 128 lanes (exact:
        # padded lanes are GELU(0)=0 and multiply zero rows of the up weight).
        a = jnp.dot(attn.astype(cdt), wdt_ref[...],
                    preferred_element_type=f32) + bd_ref[...]      # (TQ, Rp)
        a = 0.5 * a * (1.0 + jax.lax.erf(a * (1.0 / math.sqrt(2.0))))  # exact GELU
        ad = jnp.dot(a.astype(cdt), wut_ref[...],
                     preferred_element_type=f32) + bu_ref[...]     # (TQ, D)

        out_ref[0] = (ad + attn).astype(out_ref.dtype)


def _pick_tile(n, preferred):
    for t in (preferred, 1024, 512, 256, 128):
        if t <= n and n % t == 0:
            return t
    return n


def attention_with_eraser(hidden_states, params, encoder_hidden_states=None,
                          attention_mask=None, *, num_heads,
                          q_tile=None, k_tile=None, compute_dtype=jnp.bfloat16):
    if attention_mask is not None:
        # TODO(synk): additive attention-mask path not implemented.
        raise NotImplementedError("attention_mask is not supported")
    if encoder_hidden_states is None:
        encoder_hidden_states = hidden_states

    B, Sq, D = hidden_states.shape
    Sk = encoder_hidden_states.shape[1]
    assert D % num_heads == 0, "hidden dim must be divisible by num_heads"
    head_dim = D // num_heads
    out_dtype = hidden_states.dtype
    cdt = compute_dtype if compute_dtype is not None else hidden_states.dtype
    f32 = jnp.float32

    # --- device VMEM capacity (for tile defaults and the vmem limit) ---
    try:
        vmem_cap = int(pltpu.get_tpu_info().vmem_capacity_bytes)
    except Exception:
        vmem_cap = 128 * 1024 * 1024
    big_vmem = vmem_cap > 96 * 1024 * 1024          # v5e/v6e (128 MiB) vs v7x (64 MiB)

    if q_tile is None:
        q_tile = 512 if big_vmem else 256
    if k_tile is None:
        k_tile = 1024 if big_vmem else 512
    TQ = _pick_tile(Sq, q_tile)
    TK = _pick_tile(Sk, k_tile)
    # v7x megacore: keep the parallel grid extent >= 2 so both TensorCores get work.
    while B * (Sq // TQ) < 2 and TQ >= 256 and Sq % (TQ // 2) == 0:
        TQ //= 2

    R = params["wd"].shape[0]
    Rp = ((R + 127) // 128) * 128                   # lane-dense adapter rank

    # --- pre-transpose weights once in HBM (PyTorch Linear: y = x @ W^T) ---
    wq_t = params["wq"].T.astype(cdt)               # (D, D)
    wk_t = params["wk"].T.astype(cdt)
    wv_t = params["wv"].T.astype(cdt)
    wo_t = params["wo"].T.astype(cdt)
    bo = params["bo"].reshape(1, D).astype(f32)
    wd_t = jnp.zeros((D, Rp), cdt).at[:, :R].set(params["wd"].T.astype(cdt))
    bd = jnp.zeros((1, Rp), f32).at[:, :R].set(params["bd"].astype(f32))
    wu_t = jnp.zeros((Rp, D), cdt).at[:R, :].set(params["wu"].T.astype(cdt))
    bu = params["bu"].reshape(1, D).astype(f32)

    # --- K/V projections hoisted out of the kernel: computed ONCE, not per q-tile ---
    hs = hidden_states.astype(cdt)
    ehs = encoder_hidden_states.astype(cdt)
    k_full = jnp.einsum("bsd,de->bse", ehs, wk_t,
                        preferred_element_type=f32).astype(cdt)    # (B, Sk, D)
    v_full = jnp.einsum("bsd,de->bse", ehs, wv_t,
                        preferred_element_type=f32).astype(cdt)    # (B, Sk, D)

    # --- VMEM footprint estimate -> per-generation vmem limit (not hard-coded) ---
    lane = lambda n: ((n + 127) // 128) * 128
    itm = jnp.dtype(cdt).itemsize
    oitm = jnp.dtype(out_dtype).itemsize
    wbytes = 2 * (2 * D * lane(D) + D * lane(Rp) + Rp * lane(D)) * itm \
        + 2 * 8 * (2 * lane(D) + lane(Rp)) * 4                     # biases (padded)
    io_bytes = 2 * (TQ * lane(D) * itm + 2 * TK * lane(D) * itm + TQ * lane(D) * oitm)
    scratch_bytes = TQ * lane(D) * itm + 2 * TQ * lane(num_heads) * 4 + TQ * lane(D) * 4
    footprint = wbytes + io_bytes + scratch_bytes
    vmem_limit = max(32 << 20,
                     min(int(footprint * 1.3) + (8 << 20), int(0.85 * vmem_cap)))

    kernel = functools.partial(_attn_eraser_kernel,
                               num_heads=num_heads, head_dim=head_dim,
                               scale=1.0 / math.sqrt(head_dim))

    def build(weight_pipeline_mode):
        def const(shape):
            if weight_pipeline_mode is None:
                return pl.BlockSpec(shape, lambda b, qi, ki: (0, 0))
            return pl.BlockSpec(shape, lambda b, qi, ki: (0, 0),
                                pipeline_mode=weight_pipeline_mode)

        return pl.pallas_call(
            kernel,
            out_shape=jax.ShapeDtypeStruct((B, Sq, D), out_dtype),
            grid_spec=pltpu.PrefetchScalarGridSpec(
                num_scalar_prefetch=0,
                grid=(B, Sq // TQ, Sk // TK),
                in_specs=[
                    pl.BlockSpec((1, TQ, D), lambda b, qi, ki: (b, qi, 0)),  # hidden
                    pl.BlockSpec((1, TK, D), lambda b, qi, ki: (b, ki, 0)),  # K
                    pl.BlockSpec((1, TK, D), lambda b, qi, ki: (b, ki, 0)),  # V
                    const((D, D)),                                           # wq^T
                    const((D, D)),                                           # wo^T
                    const((1, D)),                                           # bo
                    const((D, Rp)),                                          # wd^T (pad)
                    const((1, Rp)),                                          # bd (pad)
                    const((Rp, D)),                                          # wu^T (pad)
                    const((1, D)),                                           # bu
                ],
                out_specs=pl.BlockSpec((1, TQ, D), lambda b, qi, ki: (b, qi, 0)),
                scratch_shapes=[
                    pltpu.VMEM((TQ, D), cdt),                       # q cache
                    pltpu.VMEM((TQ, num_heads), jnp.float32),       # running max (lane-packed)
                    pltpu.VMEM((TQ, num_heads), jnp.float32),       # running sum (lane-packed)
                    pltpu.VMEM((TQ, D), jnp.float32),               # context accumulator slab
                ],
            ),
            compiler_params=pltpu.CompilerParams(
                dimension_semantics=("parallel", "parallel", "arbitrary"),
                vmem_limit_bytes=vmem_limit,
            ),
        )

    args = (hs, k_full, v_full, wq_t, wo_t, bo, wd_t, bd, wu_t, bu)
    try:
        # Constant-index weights never change blocks: single-buffer them.
        return build(pl.Buffered(1))(*args)
    except Exception:
        # Fallback if this jax version rejects buffer_count=1 / pipeline_mode.
        return build(None)(*args)


def reference(hidden_states, params, encoder_hidden_states=None, *, num_heads):
    # Pure-JAX reference of the same forward, for a correctness check.
    if encoder_hidden_states is None:
        encoder_hidden_states = hidden_states
    B, Sq, D = hidden_states.shape
    Dh = D // num_heads
    q = hidden_states @ params["wq"].T
    k = encoder_hidden_states @ params["wk"].T
    v = encoder_hidden_states @ params["wv"].T

    def split(x):
        b, s, _ = x.shape
        return x.reshape(b, s, num_heads, Dh).transpose(0, 2, 1, 3)

    qh, kh, vh = split(q), split(k), split(v)
    s = jnp.einsum("bhqd,bhkd->bhqk", qh, kh) / math.sqrt(Dh)
    p = jax.nn.softmax(s, axis=-1)
    ctx = jnp.einsum("bhqk,bhkd->bhqd", p, vh).transpose(0, 2, 1, 3).reshape(B, Sq, D)
    attn_out = ctx @ params["wo"].T + params["bo"]
    a = jax.nn.gelu(attn_out @ params["wd"].T + params["bd"], approximate=False)
    ad = a @ params["wu"].T + params["bu"]
    return ad + attn_out


if __name__ == "__main__":
    B, S, D = 2, 8, 32
    num_heads = 4
    eraser_rank = 8

    key = jax.random.PRNGKey(0)
    ks = jax.random.split(key, 8)
    init = lambda k, shape: (0.02 * jax.random.normal(k, shape)).astype(jnp.float32)

    params = {
        "wq": init(ks[0], (D, D)),
        "wk": init(ks[1], (D, D)),
        "wv": init(ks[2], (D, D)),
        "wo": init(ks[3], (D, D)),
        "bo": init(ks[4], (D,)),
        "wd": init(ks[5], (eraser_rank, D)),   # adapter.down.weight
        "bd": init(ks[6], (eraser_rank,)),     # adapter.down.bias
        # zero_module(nn.Linear(mid_dim, dim)) -> up weight & bias are zero
        "wu": jnp.zeros((D, eraser_rank), jnp.float32),
        "bu": jnp.zeros((D,), jnp.float32),
    }

    hidden_states = jax.random.normal(ks[7], (B, S, D), dtype=jnp.float32)
    ref = reference(hidden_states, params, None, num_heads=num_heads)

    # Default path: bf16 MXU operands, f32 accumulation.
    out = attention_with_eraser(hidden_states, params,
                                encoder_hidden_states=None,
                                num_heads=num_heads)
    out = jax.block_until_ready(out)
    assert out.shape == (B, S, D)
    assert out.dtype == hidden_states.dtype
    assert jnp.allclose(out, ref, atol=3e-3, rtol=3e-2), "bf16-compute mismatch"

    # Full-f32 compute path (tighter tolerance; only approx-reciprocal relaxation).
    out_f32 = attention_with_eraser(hidden_states, params,
                                    encoder_hidden_states=None,
                                    num_heads=num_heads,
                                    compute_dtype=jnp.float32)
    out_f32 = jax.block_until_ready(out_f32)
    assert jnp.allclose(out_f32, ref, atol=2e-3, rtol=2e-3), "f32-compute mismatch"

    print("KERNEL_OK")
</pallas_src>

<mosaic_0001>
module attributes {stable_mosaic.version = 11 : i64} {
  func.func @_attn_eraser_kernel(%arg0: i32, %arg1: i32, %arg2: i32, %arg3: memref<1x8x32xbf16, #tpu.memory_space<vmem>>, %arg4: memref<1x8x32xbf16, #tpu.memory_space<vmem>>, %arg5: memref<1x8x32xbf16, #tpu.memory_space<vmem>>, %arg6: memref<32x32xbf16, #tpu.memory_space<vmem>>, %arg7: memref<32x32xbf16, #tpu.memory_space<vmem>>, %arg8: memref<1x32xf32, #tpu.memory_space<vmem>>, %arg9: memref<32x128xbf16, #tpu.memory_space<vmem>>, %arg10: memref<1x128xf32, #tpu.memory_space<vmem>>, %arg11: memref<128x32xbf16, #tpu.memory_space<vmem>>, %arg12: memref<1x32xf32, #tpu.memory_space<vmem>>, %arg13: memref<1x8x32xf32, #tpu.memory_space<vmem>>, %arg14: memref<8x32xbf16, #tpu.memory_space<vmem>>, %arg15: memref<8x4xf32, #tpu.memory_space<vmem>>, %arg16: memref<8x4xf32, #tpu.memory_space<vmem>>, %arg17: memref<8x32xf32, #tpu.memory_space<vmem>>) attributes {dimension_semantics = [#tpu.dimension_semantics<parallel>, #tpu.dimension_semantics<parallel>, #tpu.dimension_semantics<arbitrary>], iteration_bounds = array<i64: 2, 1, 1>, scalar_prefetch = 0 : i64, scratch_operands = 4 : i64, tpu.core_type = #tpu.core_type<tc>, window_params = [{transform_indices = @transform_0, window_bounds = array<i64: 1, 8, 32>}, {transform_indices = @transform_1, window_bounds = array<i64: 1, 8, 32>}, {transform_indices = @transform_2, window_bounds = array<i64: 1, 8, 32>}, {pipeline_mode = #tpu.pipeline_mode<synchronous>, transform_indices = @transform_3, window_bounds = array<i64: 32, 32>}, {pipeline_mode = #tpu.pipeline_mode<synchronous>, transform_indices = @transform_4, window_bounds = array<i64: 32, 32>}, {pipeline_mode = #tpu.pipeline_mode<synchronous>, transform_indices = @transform_5, window_bounds = array<i64: 1, 32>}, {pipeline_mode = #tpu.pipeline_mode<synchronous>, transform_indices = @transform_6, window_bounds = array<i64: 32, 128>}, {pipeline_mode = #tpu.pipeline_mode<synchronous>, transform_indices = @transform_7, window_bounds = array<i64: 1, 128>}, {pipeline_mode = #tpu.pipeline_mode<synchronous>, transform_indices = @transform_8, window_bounds = array<i64: 128, 32>}, {pipeline_mode = #tpu.pipeline_mode<synchronous>, transform_indices = @transform_9, window_bounds = array<i64: 1, 32>}, {transform_indices = @transform_10, window_bounds = array<i64: 1, 8, 32>}]} {
    %c0_i32 = arith.constant 0 : i32
    %0 = arith.cmpi eq, %arg2, %c0_i32 : i32
    %1 = arith.extui %0 : i1 to i32
    %c0_i32_0 = arith.constant 0 : i32
    %2 = arith.cmpi ne, %1, %c0_i32_0 : i32
    scf.if %2 {
      %c0_73 = arith.constant 0 : index
      %c0_74 = arith.constant 0 : index
      %c0_75 = arith.constant 0 : index
      %118 = vector.load %arg3[%c0_73, %c0_74, %c0_75] : memref<1x8x32xbf16, #tpu.memory_space<vmem>>, vector<1x8x32xbf16>
      %119 = vector.shape_cast %118 : vector<1x8x32xbf16> to vector<8x32xbf16>
      %c0_76 = arith.constant 0 : index
      %c0_77 = arith.constant 0 : index
      %120 = vector.load %arg6[%c0_76, %c0_77] : memref<32x32xbf16, #tpu.memory_space<vmem>>, vector<32x32xbf16>
      %cst_78 = arith.constant dense<0.000000e+00> : vector<8x32xf32>
      %121 = tpu.matmul %119, %120, %cst_78 {dimension_numbers = #tpu.dot_dimension_numbers<[1], [0], [0], [1], [0, 0, 1, 1], [], []>} : vector<8x32xbf16>, vector<32x32xbf16>, vector<8x32xf32> -> vector<8x32xf32>
      %cst_79 = arith.constant 0.353553385 : f32
      %122 = vector.broadcast %cst_79 : f32 to vector<8x32xf32>
      %123 = arith.mulf %121, %122 : vector<8x32xf32>
      %124 = arith.truncf %123 : vector<8x32xf32> to vector<8x32xbf16>
      %c0_80 = arith.constant 0 : index
      %c0_81 = arith.constant 0 : index
      %125 = vector.load %arg14[%c0_80, %c0_81] : memref<8x32xbf16, #tpu.memory_space<vmem>>, vector<8x32xbf16>
      tpu.vector_store %arg14[%c0_80, %c0_81], %124 {strides = array<i32>} : memref<8x32xbf16, #tpu.memory_space<vmem>>, vector<8x32xbf16>,
      %cst_82 = arith.constant 0xFF800000 : f32
      %126 = vector.broadcast %cst_82 : f32 to vector<8x4xf32>
      %c0_83 = arith.constant 0 : index
      %c0_84 = arith.constant 0 : index
      %127 = vector.load %arg15[%c0_83, %c0_84] : memref<8x4xf32, #tpu.memory_space<vmem>>, vector<8x4xf32>
      tpu.vector_store %arg15[%c0_83, %c0_84], %126 {strides = array<i32>} : memref<8x4xf32, #tpu.memory_space<vmem>>, vector<8x4xf32>,
      %cst_85 = arith.constant 0.000000e+00 : f32
      %128 = vector.broadcast %cst_85 : f32 to vector<8x4xf32>
      %c0_86 = arith.constant 0 : index
      %c0_87 = arith.constant 0 : index
      %129 = vector.load %arg16[%c0_86, %c0_87] : memref<8x4xf32, #tpu.memory_space<vmem>>, vector<8x4xf32>
      tpu.vector_store %arg16[%c0_86, %c0_87], %128 {strides = array<i32>} : memref<8x4xf32, #tpu.memory_space<vmem>>, vector<8x4xf32>,
      %cst_88 = arith.constant 0.000000e+00 : f32
      %130 = vector.broadcast %cst_88 : f32 to vector<8x32xf32>
      %c0_89 = arith.constant 0 : index
      %c0_90 = arith.constant 0 : index
      %131 = vector.load %arg17[%c0_89, %c0_90] : memref<8x32xf32, #tpu.memory_space<vmem>>, vector<8x32xf32>
      tpu.vector_store %arg17[%c0_89, %c0_90], %130 {strides = array<i32>} : memref<8x32xf32, #tpu.memory_space<vmem>>, vector<8x32xf32>,
    } else {
    }
    %c0 = arith.constant 0 : index
    %c0_1 = arith.constant 0 : index
    %c0_2 = arith.constant 0 : index
    %3 = vector.load %arg4[%c0, %c0_1, %c0_2] : memref<1x8x32xbf16, #tpu.memory_space<vmem>>, vector<1x8x32xbf16>
    %4 = vector.shape_cast %3 : vector<1x8x32xbf16> to vector<8x32xbf16>
    %c0_3 = arith.constant 0 : index
    %c0_4 = arith.constant 0 : index
    %c0_5 = arith.constant 0 : index
    %5 = vector.load %arg5[%c0_3, %c0_4, %c0_5] : memref<1x8x32xbf16, #tpu.memory_space<vmem>>, vector<1x8x32xbf16>
    %6 = vector.shape_cast %5 : vector<1x8x32xbf16> to vector<8x32xbf16>
    %c0_6 = arith.constant 0 : index
    %c0_7 = arith.constant 0 : index
    %7 = vector.load %arg14[%c0_6, %c0_7] : memref<8x32xbf16, #tpu.memory_space<vmem>>, vector<8x8xbf16>
    %8 = vector.extract_strided_slice %4 {offsets = [0, 0], sizes = [8, 8], strides = [1, 1]} : vector<8x32xbf16> to vector<8x8xbf16>
    %9 = vector.extract_strided_slice %6 {offsets = [0, 0], sizes = [8, 8], strides = [1, 1]} : vector<8x32xbf16> to vector<8x8xbf16>
    %cst = arith.constant dense<0.000000e+00> : vector<8x8xf32>
    %10 = tpu.matmul %7, %8, %cst {dimension_numbers = #tpu.dot_dimension_numbers<[1], [1], [0], [0], [0, 0, 1, 0], [], []>} : vector<8x8xbf16>, vector<8x8xbf16>, vector<8x8xf32> -> vector<8x8xf32>
    %c0_8 = arith.constant 0 : index
    %c0_9 = arith.constant 0 : index
    %11 = vector.load %arg15[%c0_8, %c0_9] : memref<8x4xf32, #tpu.memory_space<vmem>>, vector<8x1xf32>
    %cst_10 = arith.constant dense<0xFF800000> : vector<8xf32>
    %12 = vector.multi_reduction <maximumf>, %10, %cst_10 [1] : vector<8x8xf32> to vector<8xf32>
    %13 = vector.shape_cast %12 : vector<8xf32> to vector<8x1xf32>
    %14 = arith.maximumf %11, %13 : vector<8x1xf32>
    %15 = arith.subf %11, %14 : vector<8x1xf32>
    %16 = math.exp %15 : vector<8x1xf32>
    %17 = vector.broadcast %14 : vector<8x1xf32> to vector<8x8xf32>
    %18 = arith.subf %10, %17 : vector<8x8xf32>
    %19 = math.exp %18 : vector<8x8xf32>
    %c0_11 = arith.constant 0 : index
    %c0_12 = arith.constant 0 : index
    %20 = vector.load %arg16[%c0_11, %c0_12] : memref<8x4xf32, #tpu.memory_space<vmem>>, vector<8x1xf32>
    %21 = arith.mulf %16, %20 : vector<8x1xf32>
    %cst_13 = arith.constant dense<0.000000e+00> : vector<8xf32>
    %22 = vector.multi_reduction <add>, %19, %cst_13 [1] : vector<8x8xf32> to vector<8xf32>
    %23 = vector.shape_cast %22 : vector<8xf32> to vector<8x1xf32>
    %24 = arith.addf %21, %23 : vector<8x1xf32>
    %c0_14 = arith.constant 0 : index
    %c0_15 = arith.constant 0 : index
    %25 = vector.load %arg16[%c0_14, %c0_15] : memref<8x4xf32, #tpu.memory_space<vmem>>, vector<8x1xf32>
    tpu.vector_store %arg16[%c0_14, %c0_15], %24 {strides = array<i32>} : memref<8x4xf32, #tpu.memory_space<vmem>>, vector<8x1xf32>,
    %c0_16 = arith.constant 0 : index
    %c0_17 = arith.constant 0 : index
    %26 = vector.load %arg17[%c0_16, %c0_17] : memref<8x32xf32, #tpu.memory_space<vmem>>, vector<8x8xf32>
    %27 = vector.broadcast %16 : vector<8x1xf32> to vector<8x8xf32>
    %28 = arith.mulf %27, %26 : vector<8x8xf32>
    %29 = arith.truncf %19 : vector<8x8xf32> to vector<8x8xbf16>
    %cst_18 = arith.constant dense<0.000000e+00> : vector<8x8xf32>
    %30 = tpu.matmul %29, %9, %cst_18 {dimension_numbers = #tpu.dot_dimension_numbers<[1], [0], [0], [1], [0, 0, 1, 1], [], []>} : vector<8x8xbf16>, vector<8x8xbf16>, vector<8x8xf32> -> vector<8x8xf32>
    %31 = arith.addf %28, %30 : vector<8x8xf32>
    %c0_19 = arith.constant 0 : index
    %c0_20 = arith.constant 0 : index
    %32 = vector.load %arg17[%c0_19, %c0_20] : memref<8x32xf32, #tpu.memory_space<vmem>>, vector<8x8xf32>
    tpu.vector_store %arg17[%c0_19, %c0_20], %31 {strides = array<i32>} : memref<8x32xf32, #tpu.memory_space<vmem>>, vector<8x8xf32>,
    %c0_21 = arith.constant 0 : index
    %c0_22 = arith.constant 0 : index
    %33 = vector.load %arg15[%c0_21, %c0_22] : memref<8x4xf32, #tpu.memory_space<vmem>>, vector<8x1xf32>
    tpu.vector_store %arg15[%c0_21, %c0_22], %14 {strides = array<i32>} : memref<8x4xf32, #tpu.memory_space<vmem>>, vector<8x1xf32>,
    %c0_23 = arith.constant 0 : index
    %c8 = arith.constant 8 : index
    %34 = vector.load %arg14[%c0_23, %c8] : memref<8x32xbf16, #tpu.memory_space<vmem>>, vector<8x8xbf16>
    %35 = vector.extract_strided_slice %4 {offsets = [0, 8], sizes = [8, 8], strides = [1, 1]} : vector<8x32xbf16> to vector<8x8xbf16>
    %36 = vector.extract_strided_slice %6 {offsets = [0, 8], sizes = [8, 8], strides = [1, 1]} : vector<8x32xbf16> to vector<8x8xbf16>
    %cst_24 = arith.constant dense<0.000000e+00> : vector<8x8xf32>
    %37 = tpu.matmul %34, %35, %cst_24 {dimension_numbers = #tpu.dot_dimension_numbers<[1], [1], [0], [0], [0, 0, 1, 0], [], []>} : vector<8x8xbf16>, vector<8x8xbf16>, vector<8x8xf32> -> vector<8x8xf32>
    %c0_25 = arith.constant 0 : index
    %c1 = arith.constant 1 : index
    %38 = vector.load %arg15[%c0_25, %c1] : memref<8x4xf32, #tpu.memory_space<vmem>>, vector<8x1xf32>
    %cst_26 = arith.constant dense<0xFF800000> : vector<8xf32>
    %39 = vector.multi_reduction <maximumf>, %37, %cst_26 [1] : vector<8x8xf32> to vector<8xf32>
    %40 = vector.shape_cast %39 : vector<8xf32> to vector<8x1xf32>
    %41 = arith.maximumf %38, %40 : vector<8x1xf32>
    %42 = arith.subf %38, %41 : vector<8x1xf32>
    %43 = math.exp %42 : vector<8x1xf32>
    %44 = vector.broadcast %41 : vector<8x1xf32> to vector<8x8xf32>
    %45 = arith.subf %37, %44 : vector<8x8xf32>
    %46 = math.exp %45 : vector<8x8xf32>
    %c0_27 = arith.constant 0 : index
    %c1_28 = arith.constant 1 : index
    %47 = vector.load %arg16[%c0_27, %c1_28] : memref<8x4xf32, #tpu.memory_space<vmem>>, vector<8x1xf32>
    %48 = arith.mulf %43, %47 : vector<8x1xf32>
    %cst_29 = arith.constant dense<0.000000e+00> : vector<8xf32>
    %49 = vector.multi_reduction <add>, %46, %cst_29 [1] : vector<8x8xf32> to vector<8xf32>
    %50 = vector.shape_cast %49 : vector<8xf32> to vector<8x1xf32>
    %51 = arith.addf %48, %50 : vector<8x1xf32>
    %c0_30 = arith.constant 0 : index
    %c1_31 = arith.constant 1 : index
    %52 = vector.load %arg16[%c0_30, %c1_31] : memref<8x4xf32, #tpu.memory_space<vmem>>, vector<8x1xf32>
    tpu.vector_store %arg16[%c0_30, %c1_31], %51 {strides = array<i32>} : memref<8x4xf32, #tpu.memory_space<vmem>>, vector<8x1xf32>,
    %c0_32 = arith.constant 0 : index
    %c8_33 = arith.constant 8 : index
    %53 = vector.load %arg17[%c0_32, %c8_33] : memref<8x32xf32, #tpu.memory_space<vmem>>, vector<8x8xf32>
    %54 = vector.broadcast %43 : vector<8x1xf32> to vector<8x8xf32>
    %55 = arith.mulf %54, %53 : vector<8x8xf32>
    %56 = arith.truncf %46 : vector<8x8xf32> to vector<8x8xbf16>
    %cst_34 = arith.constant dense<0.000000e+00> : vector<8x8xf32>
    %57 = tpu.matmul %56, %36, %cst_34 {dimension_numbers = #tpu.dot_dimension_numbers<[1], [0], [0], [1], [0, 0, 1, 1], [], []>} : vector<8x8xbf16>, vector<8x8xbf16>, vector<8x8xf32> -> vector<8x8xf32>
    %58 = arith.addf %55, %57 : vector<8x8xf32>
    %c0_35 = arith.constant 0 : index
    %c8_36 = arith.constant 8 : index
    %59 = vector.load %arg17[%c0_35, %c8_36] : memref<8x32xf32, #tpu.memory_space<vmem>>, vector<8x8xf32>
    tpu.vector_store %arg17[%c0_35, %c8_36], %58 {strides = array<i32>} : memref<8x32xf32, #tpu.memory_space<vmem>>, vector<8x8xf32>,
    %c0_37 = arith.constant 0 : index
    %c1_38 = arith.constant 1 : index
    %60 = vector.load %arg15[%c0_37, %c1_38] : memref<8x4xf32, #tpu.memory_space<vmem>>, vector<8x1xf32>
    tpu.vector_store %arg15[%c0_37, %c1_38], %41 {strides = array<i32>} : memref<8x4xf32, #tpu.memory_space<vmem>>, vector<8x1xf32>,
    %c0_39 = arith.constant 0 : index
    %c16 = arith.constant 16 : index
    %61 = vector.load %arg14[%c0_39, %c16] : memref<8x32xbf16, #tpu.memory_space<vmem>>, vector<8x8xbf16>
    %62 = vector.extract_strided_slice %4 {offsets = [0, 16], sizes = [8, 8], strides = [1, 1]} : vector<8x32xbf16> to vector<8x8xbf16>
    %63 = vector.extract_strided_slice %6 {offsets = [0, 16], sizes = [8, 8], strides = [1, 1]} : vector<8x32xbf16> to vector<8x8xbf16>
    %cst_40 = arith.constant dense<0.000000e+00> : vector<8x8xf32>
    %64 = tpu.matmul %61, %62, %cst_40 {dimension_numbers = #tpu.dot_dimension_numbers<[1], [1], [0], [0], [0, 0, 1, 0], [], []>} : vector<8x8xbf16>, vector<8x8xbf16>, vector<8x8xf32> -> vector<8x8xf32>
    %c0_41 = arith.constant 0 : index
    %c2 = arith.constant 2 : index
    %65 = vector.load %arg15[%c0_41, %c2] : memref<8x4xf32, #tpu.memory_space<vmem>>, vector<8x1xf32>
    %cst_42 = arith.constant dense<0xFF800000> : vector<8xf32>
    %66 = vector.multi_reduction <maximumf>, %64, %cst_42 [1] : vector<8x8xf32> to vector<8xf32>
    %67 = vector.shape_cast %66 : vector<8xf32> to vector<8x1xf32>
    %68 = arith.maximumf %65, %67 : vector<8x1xf32>
    %69 = arith.subf %65, %68 : vector<8x1xf32>
    %70 = math.exp %69 : vector<8x1xf32>
    %71 = vector.broadcast %68 : vector<8x1xf32> to vector<8x8xf32>
    %72 = arith.subf %64, %71 : vector<8x8xf32>
    %73 = math.exp %72 : vector<8x8xf32>
    %c0_43 = arith.constant 0 : index
    %c2_44 = arith.constant 2 : index
    %74 = vector.load %arg16[%c0_43, %c2_44] : memref<8x4xf32, #tpu.memory_space<vmem>>, vector<8x1xf32>
    %75 = arith.mulf %70, %74 : vector<8x1xf32>
    %cst_45 = arith.constant dense<0.000000e+00> : vector<8xf32>
    %76 = vector.multi_reduction <add>, %73, %cst_45 [1] : vector<8x8xf32> to vector<8xf32>
    %77 = vector.shape_cast %76 : vector<8xf32> to vector<8x1xf32>
    %78 = arith.addf %75, %77 : vector<8x1xf32>
    %c0_46 = arith.constant 0 : index
    %c2_47 = arith.constant 2 : index
    %79 = vector.load %arg16[%c0_46, %c2_47] : memref<8x4xf32, #tpu.memory_space<vmem>>, vector<8x1xf32>
    tpu.vector_store %arg16[%c0_46, %c2_47], %78 {strides = array<i32>} : memref<8x4xf32, #tpu.memory_space<vmem>>, vector<8x1xf32>,
    %c0_48 = arith.constant 0 : index
    %c16_49 = arith.constant 16 : index
    %80 = vector.load %arg17[%c0_48, %c16_49] : memref<8x32xf32, #tpu.memory_space<vmem>>, vector<8x8xf32>
    %81 = vector.broadcast %70 : vector<8x1xf32> to vector<8x8xf32>
    %82 = arith.mulf %81, %80 : vector<8x8xf32>
    %83 = arith.truncf %73 : vector<8x8xf32> to vector<8x8xbf16>
    %cst_50 = arith.constant dense<0.000000e+00> : vector<8x8xf32>
    %84 = tpu.matmul %83, %63, %cst_50 {dimension_numbers = #tpu.dot_dimension_numbers<[1], [0], [0], [1], [0, 0, 1, 1], [], []>} : vector<8x8xbf16>, vector<8x8xbf16>, vector<8x8xf32> -> vector<8x8xf32>
    %85 = arith.addf %82, %84 : vector<8x8xf32>
    %c0_51 = arith.constant 0 : index
    %c16_52 = arith.constant 16 : index
    %86 = vector.load %arg17[%c0_51, %c16_52] : memref<8x32xf32, #tpu.memory_space<vmem>>, vector<8x8xf32>
    tpu.vector_store %arg17[%c0_51, %c16_52], %85 {strides = array<i32>} : memref<8x32xf32, #tpu.memory_space<vmem>>, vector<8x8xf32>,
    %c0_53 = arith.constant 0 : index
    %c2_54 = arith.constant 2 : index
    %87 = vector.load %arg15[%c0_53, %c2_54] : memref<8x4xf32, #tpu.memory_space<vmem>>, vector<8x1xf32>
    tpu.vector_store %arg15[%c0_53, %c2_54], %68 {strides = array<i32>} : memref<8x4xf32, #tpu.memory_space<vmem>>, vector<8x1xf32>,
    %c0_55 = arith.constant 0 : index
    %c24 = arith.constant 24 : index
    %88 = vector.load %arg14[%c0_55, %c24] : memref<8x32xbf16, #tpu.memory_space<vmem>>, vector<8x8xbf16>
    %89 = vector.extract_strided_slice %4 {offsets = [0, 24], sizes = [8, 8], strides = [1, 1]} : vector<8x32xbf16> to vector<8x8xbf16>
    %90 = vector.extract_strided_slice %6 {offsets = [0, 24], sizes = [8, 8], strides = [1, 1]} : vector<8x32xbf16> to vector<8x8xbf16>
    %cst_56 = arith.constant dense<0.000000e+00> : vector<8x8xf32>
    %91 = tpu.matmul %88, %89, %cst_56 {dimension_numbers = #tpu.dot_dimension_numbers<[1], [1], [0], [0], [0, 0, 1, 0], [], []>} : vector<8x8xbf16>, vector<8x8xbf16>, vector<8x8xf32> -> vector<8x8xf32>
    %c0_57 = arith.constant 0 : index
    %c3 = arith.constant 3 : index
    %92 = vector.load %arg15[%c0_57, %c3] : memref<8x4xf32, #tpu.memory_space<vmem>>, vector<8x1xf32>
    %cst_58 = arith.constant dense<0xFF800000> : vector<8xf32>
    %93 = vector.multi_reduction <maximumf>, %91, %cst_58 [1] : vector<8x8xf32> to vector<8xf32>
    %94 = vector.shape_cast %93 : vector<8xf32> to vector<8x1xf32>
    %95 = arith.maximumf %92, %94 : vector<8x1xf32>
    %96 = arith.subf %92, %95 : vector<8x1xf32>
    %97 = math.exp %96 : vector<8x1xf32>
    %98 = vector.broadcast %95 : vector<8x1xf32> to vector<8x8xf32>
    %99 = arith.subf %91, %98 : vector<8x8xf32>
    %100 = math.exp %99 : vector<8x8xf32>
    %c0_59 = arith.constant 0 : index
    %c3_60 = arith.constant 3 : index
    %101 = vector.load %arg16[%c0_59, %c3_60] : memref<8x4xf32, #tpu.memory_space<vmem>>, vector<8x1xf32>
    %102 = arith.mulf %97, %101 : vector<8x1xf32>
    %cst_61 = arith.constant dense<0.000000e+00> : vector<8xf32>
    %103 = vector.multi_reduction <add>, %100, %cst_61 [1] : vector<8x8xf32> to vector<8xf32>
    %104 = vector.shape_cast %103 : vector<8xf32> to vector<8x1xf32>
    %105 = arith.addf %102, %104 : vector<8x1xf32>
    %c0_62 = arith.constant 0 : index
    %c3_63 = arith.constant 3 : index
    %106 = vector.load %arg16[%c0_62, %c3_63] : memref<8x4xf32, #tpu.memory_space<vmem>>, vector<8x1xf32>
    tpu.vector_store %arg16[%c0_62, %c3_63], %105 {strides = array<i32>} : memref<8x4xf32, #tpu.memory_space<vmem>>, vector<8x1xf32>,
    %c0_64 = arith.constant 0 : index
    %c24_65 = arith.constant 24 : index
    %107 = vector.load %arg17[%c0_64, %c24_65] : memref<8x32xf32, #tpu.memory_space<vmem>>, vector<8x8xf32>
    %108 = vector.broadcast %97 : vector<8x1xf32> to vector<8x8xf32>
    %109 = arith.mulf %108, %107 : vector<8x8xf32>
    %110 = arith.truncf %100 : vector<8x8xf32> to vector<8x8xbf16>
    %cst_66 = arith.constant dense<0.000000e+00> : vector<8x8xf32>
    %111 = tpu.matmul %110, %90, %cst_66 {dimension_numbers = #tpu.dot_dimension_numbers<[1], [0], [0], [1], [0, 0, 1, 1], [], []>} : vector<8x8xbf16>, vector<8x8xbf16>, vector<8x8xf32> -> vector<8x8xf32>
    %112 = arith.addf %109, %111 : vector<8x8xf32>
    %c0_67 = arith.constant 0 : index
    %c24_68 = arith.constant 24 : index
    %113 = vector.load %arg17[%c0_67, %c24_68] : memref<8x32xf32, #tpu.memory_space<vmem>>, vector<8x8xf32>
    tpu.vector_store %arg17[%c0_67, %c24_68], %112 {strides = array<i32>} : memref<8x32xf32, #tpu.memory_space<vmem>>, vector<8x8xf32>,
    %c0_69 = arith.constant 0 : index
    %c3_70 = arith.constant 3 : index
    %114 = vector.load %arg15[%c0_69, %c3_70] : memref<8x4xf32, #tpu.memory_space<vmem>>, vector<8x1xf32>
    tpu.vector_store %arg15[%c0_69, %c3_70], %95 {strides = array<i32>} : memref<8x4xf32, #tpu.memory_space<vmem>>, vector<8x1xf32>,
    %c0_i32_71 = arith.constant 0 : i32
    %115 = arith.cmpi eq, %arg2, %c0_i32_71 : i32
    %116 = arith.extui %115 : i1 to i32
    %c0_i32_72 = arith.constant 0 : i32
    %117 = arith.cmpi ne, %116, %c0_i32_72 : i32
    scf.if %117 {
      %c0_73 = arith.constant 0 : index
      %c0_74 = arith.constant 0 : index
      %118 = vector.load %arg16[%c0_73, %c0_74] : memref<8x4xf32, #tpu.memory_space<vmem>>, vector<8x1xf32>
      %119 = tpu.reciprocal %118 {approx = true} : vector<8x1xf32> -> vector<8x1xf32>
      %c0_75 = arith.constant 0 : index
      %c0_76 = arith.constant 0 : index
      %120 = vector.load %arg17[%c0_75, %c0_76] : memref<8x32xf32, #tpu.memory_space<vmem>>, vector<8x8xf32>
      %121 = vector.broadcast %119 : vector<8x1xf32> to vector<8x8xf32>
      %122 = arith.mulf %120, %121 : vector<8x8xf32>
      %c0_77 = arith.constant 0 : index
      %c0_78 = arith.constant 0 : index
      %123 = vector.load %arg17[%c0_77, %c0_78] : memref<8x32xf32, #tpu.memory_space<vmem>>, vector<8x8xf32>
      tpu.vector_store %arg17[%c0_77, %c0_78], %122 {strides = array<i32>} : memref<8x32xf32, #tpu.memory_space<vmem>>, vector<8x8xf32>,
      %c0_79 = arith.constant 0 : index
      %c1_80 = arith.constant 1 : index
      %124 = vector.load %arg16[%c0_79, %c1_80] : memref<8x4xf32, #tpu.memory_space<vmem>>, vector<8x1xf32>
      %125 = tpu.reciprocal %124 {approx = true} : vector<8x1xf32> -> vector<8x1xf32>
      %c0_81 = arith.constant 0 : index
      %c8_82 = arith.constant 8 : index
      %126 = vector.load %arg17[%c0_81, %c8_82] : memref<8x32xf32, #tpu.memory_space<vmem>>, vector<8x8xf32>
      %127 = vector.broadcast %125 : vector<8x1xf32> to vector<8x8xf32>
      %128 = arith.mulf %126, %127 : vector<8x8xf32>
      %c0_83 = arith.constant 0 : index
      %c8_84 = arith.constant 8 : index
      %129 = vector.load %arg17[%c0_83, %c8_84] : memref<8x32xf32, #tpu.memory_space<vmem>>, vector<8x8xf32>
      tpu.vector_store %arg17[%c0_83, %c8_84], %128 {strides = array<i32>} : memref<8x32xf32, #tpu.memory_space<vmem>>, vector<8x8xf32>,
      %c0_85 = arith.constant 0 : index
      %c2_86 = arith.constant 2 : index
      %130 = vector.load %arg16[%c0_85, %c2_86] : memref<8x4xf32, #tpu.memory_space<vmem>>, vector<8x1xf32>
      %131 = tpu.reciprocal %130 {approx = true} : vector<8x1xf32> -> vector<8x1xf32>
      %c0_87 = arith.constant 0 : index
      %c16_88 = arith.constant 16 : index
      %132 = vector.load %arg17[%c0_87, %c16_88] : memref<8x32xf32, #tpu.memory_space<vmem>>, vector<8x8xf32>
      %133 = vector.broadcast %131 : vector<8x1xf32> to vector<8x8xf32>
      %134 = arith.mulf %132, %133 : vector<8x8xf32>
      %c0_89 = arith.constant 0 : index
      %c16_90 = arith.constant 16 : index
      %135 = vector.load %arg17[%c0_89, %c16_90] : memref<8x32xf32, #tpu.memory_space<vmem>>, vector<8x8xf32>
      tpu.vector_store %arg17[%c0_89, %c16_90], %134 {strides = array<i32>} : memref<8x32xf32, #tpu.memory_space<vmem>>, vector<8x8xf32>,
      %c0_91 = arith.constant 0 : index
      %c3_92 = arith.constant 3 : index
      %136 = vector.load %arg16[%c0_91, %c3_92] : memref<8x4xf32, #tpu.memory_space<vmem>>, vector<8x1xf32>
      %137 = tpu.reciprocal %136 {approx = true} : vector<8x1xf32> -> vector<8x1xf32>
      %c0_93 = arith.constant 0 : index
      %c24_94 = arith.constant 24 : index
      %138 = vector.load %arg17[%c0_93, %c24_94] : memref<8x32xf32, #tpu.memory_space<vmem>>, vector<8x8xf32>
      %139 = vector.broadcast %137 : vector<8x1xf32> to vector<8x8xf32>
      %140 = arith.mulf %138, %139 : vector<8x8xf32>
      %c0_95 = arith.constant 0 : index
      %c24_96 = arith.constant 24 : index
      %141 = vector.load %arg17[%c0_95, %c24_96] : memref<8x32xf32, #tpu.memory_space<vmem>>, vector<8x8xf32>
      tpu.vector_store %arg17[%c0_95, %c24_96], %140 {strides = array<i32>} : memref<8x32xf32, #tpu.memory_space<vmem>>, vector<8x8xf32>,
      %c0_97 = arith.constant 0 : index
      %c0_98 = arith.constant 0 : index
      %142 = vector.load %arg17[%c0_97, %c0_98] : memref<8x32xf32, #tpu.memory_space<vmem>>, vector<8x32xf32>
      %143 = arith.truncf %142 : vector<8x32xf32> to vector<8x32xbf16>
      %c0_99 = arith.constant 0 : index
      %c0_100 = arith.constant 0 : index
      %144 = vector.load %arg7[%c0_99, %c0_100] : memref<32x32xbf16, #tpu.memory_space<vmem>>, vector<32x32xbf16>
      %cst_101 = arith.constant dense<0.000000e+00> : vector<8x32xf32>
      %145 = tpu.matmul %143, %144, %cst_101 {dimension_numbers = #tpu.dot_dimension_numbers<[1], [0], [0], [1], [0, 0, 1, 1], [], []>} : vector<8x32xbf16>, vector<32x32xbf16>, vector<8x32xf32> -> vector<8x32xf32>
      %c0_102 = arith.constant 0 : index
      %c0_103 = arith.constant 0 : index
      %146 = vector.load %arg8[%c0_102, %c0_103] : memref<1x32xf32, #tpu.memory_space<vmem>>, vector<1x32xf32>
      %147 = vector.broadcast %146 : vector<1x32xf32> to vector<8x32xf32>
      %148 = arith.addf %145, %147 : vector<8x32xf32>
      %149 = arith.truncf %148 : vector<8x32xf32> to vector<8x32xbf16>
      %c0_104 = arith.constant 0 : index
      %c0_105 = arith.constant 0 : index
      %150 = vector.load %arg9[%c0_104, %c0_105] : memref<32x128xbf16, #tpu.memory_space<vmem>>, vector<32x128xbf16>
      %cst_106 = arith.constant dense<0.000000e+00> : vector<8x128xf32>
      %151 = tpu.matmul %149, %150, %cst_106 {dimension_numbers = #tpu.dot_dimension_numbers<[1], [0], [0], [1], [0, 0, 1, 1], [], []>} : vector<8x32xbf16>, vector<32x128xbf16>, vector<8x128xf32> -> vector<8x128xf32>
      %c0_107 = arith.constant 0 : index
      %c0_108 = arith.constant 0 : index
      %152 = vector.load %arg10[%c0_107, %c0_108] : memref<1x128xf32, #tpu.memory_space<vmem>>, vector<1x128xf32>
      %153 = vector.broadcast %152 : vector<1x128xf32> to vector<8x128xf32>
      %154 = arith.addf %151, %153 : vector<8x128xf32>
      %cst_109 = arith.constant 5.000000e-01 : f32
      %155 = vector.broadcast %cst_109 : f32 to vector<8x128xf32>
      %156 = arith.mulf %155, %154 : vector<8x128xf32>
      %cst_110 = arith.constant 0.707106769 : f32
      %157 = vector.broadcast %cst_110 : f32 to vector<8x128xf32>
      %158 = arith.mulf %154, %157 : vector<8x128xf32>
      %159 = math.erf %158 : vector<8x128xf32>
      %cst_111 = arith.constant 1.000000e+00 : f32
      %160 = vector.broadcast %cst_111 : f32 to vector<8x128xf32>
      %161 = arith.addf %160, %159 : vector<8x128xf32>
      %162 = arith.mulf %156, %161 : vector<8x128xf32>
      %163 = arith.truncf %162 : vector<8x128xf32> to vector<8x128xbf16>
      %c0_112 = arith.constant 0 : index
      %c0_113 = arith.constant 0 : index
      %164 = vector.load %arg11[%c0_112, %c0_113] : memref<128x32xbf16, #tpu.memory_space<vmem>>, vector<128x32xbf16>
      %cst_114 = arith.constant dense<0.000000e+00> : vector<8x32xf32>
      %165 = tpu.matmul %163, %164, %cst_114 {dimension_numbers = #tpu.dot_dimension_numbers<[1], [0], [0], [1], [0, 0, 1, 1], [], []>} : vector<8x128xbf16>, vector<128x32xbf16>, vector<8x32xf32> -> vector<8x32xf32>
      %c0_115 = arith.constant 0 : index
      %c0_116 = arith.constant 0 : index
      %166 = vector.load %arg12[%c0_115, %c0_116] : memref<1x32xf32, #tpu.memory_space<vmem>>, vector<1x32xf32>
      %167 = vector.broadcast %166 : vector<1x32xf32> to vector<8x32xf32>
      %168 = arith.addf %165, %167 : vector<8x32xf32>
      %169 = arith.addf %168, %148 : vector<8x32xf32>
      %c0_117 = arith.constant 0 : index
      %c0_118 = arith.constant 0 : index
      %c0_119 = arith.constant 0 : index
      %170 = vector.load %arg13[%c0_117, %c0_118, %c0_119] : memref<1x8x32xf32, #tpu.memory_space<vmem>>, vector<1x8x32xf32>
      %171 = vector.shape_cast %170 : vector<1x8x32xf32> to vector<8x32xf32>
      %172 = vector.shape_cast %169 : vector<8x32xf32> to vector<1x8x32xf32>
      tpu.vector_store %arg13[%c0_117, %c0_118, %c0_119], %172 {strides = array<i32>} : memref<1x8x32xf32, #tpu.memory_space<vmem>>, vector<1x8x32xf32>,
    } else {
    }
    return
  }
  func.func @transform_0(%arg0: i32, %arg1: i32, %arg2: i32) -> (i32, i32, i32) {
    %c0_i32 = arith.constant 0 : i32
    %c0_i32_0 = arith.constant 0 : i32
    return %arg0, %arg1, %c0_i32 : i32, i32, i32
  }
  func.func @transform_1(%arg0: i32, %arg1: i32, %arg2: i32) -> (i32, i32, i32) {
    %c0_i32 = arith.constant 0 : i32
    %c0_i32_0 = arith.constant 0 : i32
    return %arg0, %arg2, %c0_i32 : i32, i32, i32
  }
  func.func @transform_2(%arg0: i32, %arg1: i32, %arg2: i32) -> (i32, i32, i32) {
    %c0_i32 = arith.constant 0 : i32
    %c0_i32_0 = arith.constant 0 : i32
    return %arg0, %arg2, %c0_i32 : i32, i32, i32
  }
  func.func @transform_3(%arg0: i32, %arg1: i32, %arg2: i32) -> (i32, i32) {
    %c0_i32 = arith.constant 0 : i32
    %c0_i32_0 = arith.constant 0 : i32
    %c0_i32_1 = arith.constant 0 : i32
    return %c0_i32, %c0_i32_0 : i32, i32
  }
  func.func @transform_4(%arg0: i32, %arg1: i32, %arg2: i32) -> (i32, i32) {
    %c0_i32 = arith.constant 0 : i32
    %c0_i32_0 = arith.constant 0 : i32
    %c0_i32_1 = arith.constant 0 : i32
    return %c0_i32, %c0_i32_0 : i32, i32
  }
  func.func @transform_5(%arg0: i32, %arg1: i32, %arg2: i32) -> (i32, i32) {
    %c0_i32 = arith.constant 0 : i32
    %c0_i32_0 = arith.constant 0 : i32
    %c0_i32_1 = arith.constant 0 : i32
    return %c0_i32, %c0_i32_0 : i32, i32
  }
  func.func @transform_6(%arg0: i32, %arg1: i32, %arg2: i32) -> (i32, i32) {
    %c0_i32 = arith.constant 0 : i32
    %c0_i32_0 = arith.constant 0 : i32
    %c0_i32_1 = arith.constant 0 : i32
    return %c0_i32, %c0_i32_0 : i32, i32
  }
  func.func @transform_7(%arg0: i32, %arg1: i32, %arg2: i32) -> (i32, i32) {
    %c0_i32 = arith.constant 0 : i32
    %c0_i32_0 = arith.constant 0 : i32
    %c0_i32_1 = arith.constant 0 : i32
    return %c0_i32, %c0_i32_0 : i32, i32
  }
  func.func @transform_8(%arg0: i32, %arg1: i32, %arg2: i32) -> (i32, i32) {
    %c0_i32 = arith.constant 0 : i32
    %c0_i32_0 = arith.constant 0 : i32
    %c0_i32_1 = arith.constant 0 : i32
    return %c0_i32, %c0_i32_0 : i32, i32
  }
  func.func @transform_9(%arg0: i32, %arg1: i32, %arg2: i32) -> (i32, i32) {
    %c0_i32 = arith.constant 0 : i32
    %c0_i32_0 = arith.constant 0 : i32
    %c0_i32_1 = arith.constant 0 : i32
    return %c0_i32, %c0_i32_0 : i32, i32
  }
  func.func @transform_10(%arg0: i32, %arg1: i32, %arg2: i32) -> (i32, i32, i32) {
    %c0_i32 = arith.constant 0 : i32
    %c0_i32_0 = arith.constant 0 : i32
    return %arg0, %arg1, %c0_i32 : i32, i32, i32
  }
}

module attributes {stable_mosaic.version = 11 : i64} {
  func.func @_attn_eraser_kernel(%arg0: i32, %arg1: i32, %arg2: i32, %arg3: memref<1x8x32xbf16, #tpu.memory_space<vmem>>, %arg4: memref<1x8x32xbf16, #tpu.memory_space<vmem>>, %arg5: memref<1x8x32xbf16, #tpu.memory_space<vmem>>, %arg6: memref<32x32xbf16, #tpu.memory_space<vmem>>, %arg7: memref<32x32xbf16, #tpu.memory_space<vmem>>, %arg8: memref<1x32xf32, #tpu.memory_space<vmem>>, %arg9: memref<32x128xbf16, #tpu.memory_space<vmem>>, %arg10: memref<1x128xf32, #tpu.memory_space<vmem>>, %arg11: memref<128x32xbf16, #tpu.memory_space<vmem>>, %arg12: memref<1x32xf32, #tpu.memory_space<vmem>>, %arg13: memref<1x8x32xf32, #tpu.memory_space<vmem>>, %arg14: memref<8x32xbf16, #tpu.memory_space<vmem>>, %arg15: memref<8x4xf32, #tpu.memory_space<vmem>>, %arg16: memref<8x4xf32, #tpu.memory_space<vmem>>, %arg17: memref<8x32xf32, #tpu.memory_space<vmem>>) attributes {dimension_semantics = [#tpu.dimension_semantics<parallel>, #tpu.dimension_semantics<parallel>, #tpu.dimension_semantics<arbitrary>], iteration_bounds = array<i64: 2, 1, 1>, scalar_prefetch = 0 : i64, scratch_operands = 4 : i64, tpu.core_type = #tpu.core_type<tc>, window_params = [{transform_indices = @transform_0, window_bounds = array<i64: 1, 8, 32>}, {transform_indices = @transform_1, window_bounds = array<i64: 1, 8, 32>}, {transform_indices = @transform_2, window_bounds = array<i64: 1, 8, 32>}, {pipeline_mode = #tpu.pipeline_mode<synchronous>, transform_indices = @transform_3, window_bounds = array<i64: 32, 32>}, {pipeline_mode = #tpu.pipeline_mode<synchronous>, transform_indices = @transform_4, window_bounds = array<i64: 32, 32>}, {pipeline_mode = #tpu.pipeline_mode<synchronous>, transform_indices = @transform_5, window_bounds = array<i64: 1, 32>}, {pipeline_mode = #tpu.pipeline_mode<synchronous>, transform_indices = @transform_6, window_bounds = array<i64: 32, 128>}, {pipeline_mode = #tpu.pipeline_mode<synchronous>, transform_indices = @transform_7, window_bounds = array<i64: 1, 128>}, {pipeline_mode = #tpu.pipeline_mode<synchronous>, transform_indices = @transform_8, window_bounds = array<i64: 128, 32>}, {pipeline_mode = #tpu.pipeline_mode<synchronous>, transform_indices = @transform_9, window_bounds = array<i64: 1, 32>}, {transform_indices = @transform_10, window_bounds = array<i64: 1, 8, 32>}]} {
    %c0_i32 = arith.constant 0 : i32
    %0 = arith.cmpi eq, %arg2, %c0_i32 : i32
    %1 = arith.extui %0 : i1 to i32
    %c0_i32_0 = arith.constant 0 : i32
    %2 = arith.cmpi ne, %1, %c0_i32_0 : i32
    scf.if %2 {
      %c0_73 = arith.constant 0 : index
      %c0_74 = arith.constant 0 : index
      %c0_75 = arith.constant 0 : index
      %118 = vector.load %arg3[%c0_73, %c0_74, %c0_75] : memref<1x8x32xbf16, #tpu.memory_space<vmem>>, vector<1x8x32xbf16>
      %119 = vector.shape_cast %118 : vector<1x8x32xbf16> to vector<8x32xbf16>
      %c0_76 = arith.constant 0 : index
      %c0_77 = arith.constant 0 : index
      %120 = vector.load %arg6[%c0_76, %c0_77] : memref<32x32xbf16, #tpu.memory_space<vmem>>, vector<32x32xbf16>
      %cst_78 = arith.constant dense<0.000000e+00> : vector<8x32xf32>
      %121 = tpu.matmul %119, %120, %cst_78 {dimension_numbers = #tpu.dot_dimension_numbers<[1], [0], [0], [1], [0, 0, 1, 1], [], []>} : vector<8x32xbf16>, vector<32x32xbf16>, vector<8x32xf32> -> vector<8x32xf32>
      %cst_79 = arith.constant 0.353553385 : f32
      %122 = vector.broadcast %cst_79 : f32 to vector<8x32xf32>
      %123 = arith.mulf %121, %122 : vector<8x32xf32>
      %124 = arith.truncf %123 : vector<8x32xf32> to vector<8x32xbf16>
      %c0_80 = arith.constant 0 : index
      %c0_81 = arith.constant 0 : index
      %125 = vector.load %arg14[%c0_80, %c0_81] : memref<8x32xbf16, #tpu.memory_space<vmem>>, vector<8x32xbf16>
      tpu.vector_store %arg14[%c0_80, %c0_81], %124 {strides = array<i32>} : memref<8x32xbf16, #tpu.memory_space<vmem>>, vector<8x32xbf16>,
      %cst_82 = arith.constant 0xFF800000 : f32
      %126 = vector.broadcast %cst_82 : f32 to vector<8x4xf32>
      %c0_83 = arith.constant 0 : index
      %c0_84 = arith.constant 0 : index
      %127 = vector.load %arg15[%c0_83, %c0_84] : memref<8x4xf32, #tpu.memory_space<vmem>>, vector<8x4xf32>
      tpu.vector_store %arg15[%c0_83, %c0_84], %126 {strides = array<i32>} : memref<8x4xf32, #tpu.memory_space<vmem>>, vector<8x4xf32>,
      %cst_85 = arith.constant 0.000000e+00 : f32
      %128 = vector.broadcast %cst_85 : f32 to vector<8x4xf32>
      %c0_86 = arith.constant 0 : index
      %c0_87 = arith.constant 0 : index
      %129 = vector.load %arg16[%c0_86, %c0_87] : memref<8x4xf32, #tpu.memory_space<vmem>>, vector<8x4xf32>
      tpu.vector_store %arg16[%c0_86, %c0_87], %128 {strides = array<i32>} : memref<8x4xf32, #tpu.memory_space<vmem>>, vector<8x4xf32>,
      %cst_88 = arith.constant 0.000000e+00 : f32
      %130 = vector.broadcast %cst_88 : f32 to vector<8x32xf32>
      %c0_89 = arith.constant 0 : index
      %c0_90 = arith.constant 0 : index
      %131 = vector.load %arg17[%c0_89, %c0_90] : memref<8x32xf32, #tpu.memory_space<vmem>>, vector<8x32xf32>
      tpu.vector_store %arg17[%c0_89, %c0_90], %130 {strides = array<i32>} : memref<8x32xf32, #tpu.memory_space<vmem>>, vector<8x32xf32>,
    } else {
    }
    %c0 = arith.constant 0 : index
    %c0_1 = arith.constant 0 : index
    %c0_2 = arith.constant 0 : index
    %3 = vector.load %arg4[%c0, %c0_1, %c0_2] : memref<1x8x32xbf16, #tpu.memory_space<vmem>>, vector<1x8x32xbf16>
    %4 = vector.shape_cast %3 : vector<1x8x32xbf16> to vector<8x32xbf16>
    %c0_3 = arith.constant 0 : index
    %c0_4 = arith.constant 0 : index
    %c0_5 = arith.constant 0 : index
    %5 = vector.load %arg5[%c0_3, %c0_4, %c0_5] : memref<1x8x32xbf16, #tpu.memory_space<vmem>>, vector<1x8x32xbf16>
    %6 = vector.shape_cast %5 : vector<1x8x32xbf16> to vector<8x32xbf16>
    %c0_6 = arith.constant 0 : index
    %c0_7 = arith.constant 0 : index
    %7 = vector.load %arg14[%c0_6, %c0_7] : memref<8x32xbf16, #tpu.memory_space<vmem>>, vector<8x8xbf16>
    %8 = vector.extract_strided_slice %4 {offsets = [0, 0], sizes = [8, 8], strides = [1, 1]} : vector<8x32xbf16> to vector<8x8xbf16>
    %9 = vector.extract_strided_slice %6 {offsets = [0, 0], sizes = [8, 8], strides = [1, 1]} : vector<8x32xbf16> to vector<8x8xbf16>
    %cst = arith.constant dense<0.000000e+00> : vector<8x8xf32>
    %10 = tpu.matmul %7, %8, %cst {dimension_numbers = #tpu.dot_dimension_numbers<[1], [1], [0], [0], [0, 0, 1, 0], [], []>} : vector<8x8xbf16>, vector<8x8xbf16>, vector<8x8xf32> -> vector<8x8xf32>
    %c0_8 = arith.constant 0 : index
    %c0_9 = arith.constant 0 : index
    %11 = vector.load %arg15[%c0_8, %c0_9] : memref<8x4xf32, #tpu.memory_space<vmem>>, vector<8x1xf32>
    %cst_10 = arith.constant dense<0xFF800000> : vector<8xf32>
    %12 = vector.multi_reduction <maximumf>, %10, %cst_10 [1] : vector<8x8xf32> to vector<8xf32>
    %13 = vector.shape_cast %12 : vector<8xf32> to vector<8x1xf32>
    %14 = arith.maximumf %11, %13 : vector<8x1xf32>
    %15 = arith.subf %11, %14 : vector<8x1xf32>
    %16 = math.exp %15 : vector<8x1xf32>
    %17 = vector.broadcast %14 : vector<8x1xf32> to vector<8x8xf32>
    %18 = arith.subf %10, %17 : vector<8x8xf32>
    %19 = math.exp %18 : vector<8x8xf32>
    %c0_11 = arith.constant 0 : index
    %c0_12 = arith.constant 0 : index
    %20 = vector.load %arg16[%c0_11, %c0_12] : memref<8x4xf32, #tpu.memory_space<vmem>>, vector<8x1xf32>
    %21 = arith.mulf %16, %20 : vector<8x1xf32>
    %cst_13 = arith.constant dense<0.000000e+00> : vector<8xf32>
    %22 = vector.multi_reduction <add>, %19, %cst_13 [1] : vector<8x8xf32> to vector<8xf32>
    %23 = vector.shape_cast %22 : vector<8xf32> to vector<8x1xf32>
    %24 = arith.addf %21, %23 : vector<8x1xf32>
    %c0_14 = arith.constant 0 : index
    %c0_15 = arith.constant 0 : index
    %25 = vector.load %arg16[%c0_14, %c0_15] : memref<8x4xf32, #tpu.memory_space<vmem>>, vector<8x1xf32>
    tpu.vector_store %arg16[%c0_14, %c0_15], %24 {strides = array<i32>} : memref<8x4xf32, #tpu.memory_space<vmem>>, vector<8x1xf32>,
    %c0_16 = arith.constant 0 : index
    %c0_17 = arith.constant 0 : index
    %26 = vector.load %arg17[%c0_16, %c0_17] : memref<8x32xf32, #tpu.memory_space<vmem>>, vector<8x8xf32>
    %27 = vector.broadcast %16 : vector<8x1xf32> to vector<8x8xf32>
    %28 = arith.mulf %27, %26 : vector<8x8xf32>
    %29 = arith.truncf %19 : vector<8x8xf32> to vector<8x8xbf16>
    %cst_18 = arith.constant dense<0.000000e+00> : vector<8x8xf32>
    %30 = tpu.matmul %29, %9, %cst_18 {dimension_numbers = #tpu.dot_dimension_numbers<[1], [0], [0], [1], [0, 0, 1, 1], [], []>} : vector<8x8xbf16>, vector<8x8xbf16>, vector<8x8xf32> -> vector<8x8xf32>
    %31 = arith.addf %28, %30 : vector<8x8xf32>
    %c0_19 = arith.constant 0 : index
    %c0_20 = arith.constant 0 : index
    %32 = vector.load %arg17[%c0_19, %c0_20] : memref<8x32xf32, #tpu.memory_space<vmem>>, vector<8x8xf32>
    tpu.vector_store %arg17[%c0_19, %c0_20], %31 {strides = array<i32>} : memref<8x32xf32, #tpu.memory_space<vmem>>, vector<8x8xf32>,
    %c0_21 = arith.constant 0 : index
    %c0_22 = arith.constant 0 : index
    %33 = vector.load %arg15[%c0_21, %c0_22] : memref<8x4xf32, #tpu.memory_space<vmem>>, vector<8x1xf32>
    tpu.vector_store %arg15[%c0_21, %c0_22], %14 {strides = array<i32>} : memref<8x4xf32, #tpu.memory_space<vmem>>, vector<8x1xf32>,
    %c0_23 = arith.constant 0 : index
    %c8 = arith.constant 8 : index
    %34 = vector.load %arg14[%c0_23, %c8] : memref<8x32xbf16, #tpu.memory_space<vmem>>, vector<8x8xbf16>
    %35 = vector.extract_strided_slice %4 {offsets = [0, 8], sizes = [8, 8], strides = [1, 1]} : vector<8x32xbf16> to vector<8x8xbf16>
    %36 = vector.extract_strided_slice %6 {offsets = [0, 8], sizes = [8, 8], strides = [1, 1]} : vector<8x32xbf16> to vector<8x8xbf16>
    %cst_24 = arith.constant dense<0.000000e+00> : vector<8x8xf32>
    %37 = tpu.matmul %34, %35, %cst_24 {dimension_numbers = #tpu.dot_dimension_numbers<[1], [1], [0], [0], [0, 0, 1, 0], [], []>} : vector<8x8xbf16>, vector<8x8xbf16>, vector<8x8xf32> -> vector<8x8xf32>
    %c0_25 = arith.constant 0 : index
    %c1 = arith.constant 1 : index
    %38 = vector.load %arg15[%c0_25, %c1] : memref<8x4xf32, #tpu.memory_space<vmem>>, vector<8x1xf32>
    %cst_26 = arith.constant dense<0xFF800000> : vector<8xf32>
    %39 = vector.multi_reduction <maximumf>, %37, %cst_26 [1] : vector<8x8xf32> to vector<8xf32>
    %40 = vector.shape_cast %39 : vector<8xf32> to vector<8x1xf32>
    %41 = arith.maximumf %38, %40 : vector<8x1xf32>
    %42 = arith.subf %38, %41 : vector<8x1xf32>
    %43 = math.exp %42 : vector<8x1xf32>
    %44 = vector.broadcast %41 : vector<8x1xf32> to vector<8x8xf32>
    %45 = arith.subf %37, %44 : vector<8x8xf32>
    %46 = math.exp %45 : vector<8x8xf32>
    %c0_27 = arith.constant 0 : index
    %c1_28 = arith.constant 1 : index
    %47 = vector.load %arg16[%c0_27, %c1_28] : memref<8x4xf32, #tpu.memory_space<vmem>>, vector<8x1xf32>
    %48 = arith.mulf %43, %47 : vector<8x1xf32>
    %cst_29 = arith.constant dense<0.000000e+00> : vector<8xf32>
    %49 = vector.multi_reduction <add>, %46, %cst_29 [1] : vector<8x8xf32> to vector<8xf32>
    %50 = vector.shape_cast %49 : vector<8xf32> to vector<8x1xf32>
    %51 = arith.addf %48, %50 : vector<8x1xf32>
    %c0_30 = arith.constant 0 : index
    %c1_31 = arith.constant 1 : index
    %52 = vector.load %arg16[%c0_30, %c1_31] : memref<8x4xf32, #tpu.memory_space<vmem>>, vector<8x1xf32>
    tpu.vector_store %arg16[%c0_30, %c1_31], %51 {strides = array<i32>} : memref<8x4xf32, #tpu.memory_space<vmem>>, vector<8x1xf32>,
    %c0_32 = arith.constant 0 : index
    %c8_33 = arith.constant 8 : index
    %53 = vector.load %arg17[%c0_32, %c8_33] : memref<8x32xf32, #tpu.memory_space<vmem>>, vector<8x8xf32>
    %54 = vector.broadcast %43 : vector<8x1xf32> to vector<8x8xf32>
    %55 = arith.mulf %54, %53 : vector<8x8xf32>
    %56 = arith.truncf %46 : vector<8x8xf32> to vector<8x8xbf16>
    %cst_34 = arith.constant dense<0.000000e+00> : vector<8x8xf32>
    %57 = tpu.matmul %56, %36, %cst_34 {dimension_numbers = #tpu.dot_dimension_numbers<[1], [0], [0], [1], [0, 0, 1, 1], [], []>} : vector<8x8xbf16>, vector<8x8xbf16>, vector<8x8xf32> -> vector<8x8xf32>
    %58 = arith.addf %55, %57 : vector<8x8xf32>
    %c0_35 = arith.constant 0 : index
    %c8_36 = arith.constant 8 : index
    %59 = vector.load %arg17[%c0_35, %c8_36] : memref<8x32xf32, #tpu.memory_space<vmem>>, vector<8x8xf32>
    tpu.vector_store %arg17[%c0_35, %c8_36], %58 {strides = array<i32>} : memref<8x32xf32, #tpu.memory_space<vmem>>, vector<8x8xf32>,
    %c0_37 = arith.constant 0 : index
    %c1_38 = arith.constant 1 : index
    %60 = vector.load %arg15[%c0_37, %c1_38] : memref<8x4xf32, #tpu.memory_space<vmem>>, vector<8x1xf32>
    tpu.vector_store %arg15[%c0_37, %c1_38], %41 {strides = array<i32>} : memref<8x4xf32, #tpu.memory_space<vmem>>, vector<8x1xf32>,
    %c0_39 = arith.constant 0 : index
    %c16 = arith.constant 16 : index
    %61 = vector.load %arg14[%c0_39, %c16] : memref<8x32xbf16, #tpu.memory_space<vmem>>, vector<8x8xbf16>
    %62 = vector.extract_strided_slice %4 {offsets = [0, 16], sizes = [8, 8], strides = [1, 1]} : vector<8x32xbf16> to vector<8x8xbf16>
    %63 = vector.extract_strided_slice %6 {offsets = [0, 16], sizes = [8, 8], strides = [1, 1]} : vector<8x32xbf16> to vector<8x8xbf16>
    %cst_40 = arith.constant dense<0.000000e+00> : vector<8x8xf32>
    %64 = tpu.matmul %61, %62, %cst_40 {dimension_numbers = #tpu.dot_dimension_numbers<[1], [1], [0], [0], [0, 0, 1, 0], [], []>} : vector<8x8xbf16>, vector<8x8xbf16>, vector<8x8xf32> -> vector<8x8xf32>
    %c0_41 = arith.constant 0 : index
    %c2 = arith.constant 2 : index
    %65 = vector.load %arg15[%c0_41, %c2] : memref<8x4xf32, #tpu.memory_space<vmem>>, vector<8x1xf32>
    %cst_42 = arith.constant dense<0xFF800000> : vector<8xf32>
    %66 = vector.multi_reduction <maximumf>, %64, %cst_42 [1] : vector<8x8xf32> to vector<8xf32>
    %67 = vector.shape_cast %66 : vector<8xf32> to vector<8x1xf32>
    %68 = arith.maximumf %65, %67 : vector<8x1xf32>
    %69 = arith.subf %65, %68 : vector<8x1xf32>
    %70 = math.exp %69 : vector<8x1xf32>
    %71 = vector.broadcast %68 : vector<8x1xf32> to vector<8x8xf32>
    %72 = arith.subf %64, %71 : vector<8x8xf32>
    %73 = math.exp %72 : vector<8x8xf32>
    %c0_43 = arith.constant 0 : index
    %c2_44 = arith.constant 2 : index
    %74 = vector.load %arg16[%c0_43, %c2_44] : memref<8x4xf32, #tpu.memory_space<vmem>>, vector<8x1xf32>
    %75 = arith.mulf %70, %74 : vector<8x1xf32>
    %cst_45 = arith.constant dense<0.000000e+00> : vector<8xf32>
    %76 = vector.multi_reduction <add>, %73, %cst_45 [1] : vector<8x8xf32> to vector<8xf32>
    %77 = vector.shape_cast %76 : vector<8xf32> to vector<8x1xf32>
    %78 = arith.addf %75, %77 : vector<8x1xf32>
    %c0_46 = arith.constant 0 : index
    %c2_47 = arith.constant 2 : index
    %79 = vector.load %arg16[%c0_46, %c2_47] : memref<8x4xf32, #tpu.memory_space<vmem>>, vector<8x1xf32>
    tpu.vector_store %arg16[%c0_46, %c2_47], %78 {strides = array<i32>} : memref<8x4xf32, #tpu.memory_space<vmem>>, vector<8x1xf32>,
    %c0_48 = arith.constant 0 : index
    %c16_49 = arith.constant 16 : index
    %80 = vector.load %arg17[%c0_48, %c16_49] : memref<8x32xf32, #tpu.memory_space<vmem>>, vector<8x8xf32>
    %81 = vector.broadcast %70 : vector<8x1xf32> to vector<8x8xf32>
    %82 = arith.mulf %81, %80 : vector<8x8xf32>
    %83 = arith.truncf %73 : vector<8x8xf32> to vector<8x8xbf16>
    %cst_50 = arith.constant dense<0.000000e+00> : vector<8x8xf32>
    %84 = tpu.matmul %83, %63, %cst_50 {dimension_numbers = #tpu.dot_dimension_numbers<[1], [0], [0], [1], [0, 0, 1, 1], [], []>} : vector<8x8xbf16>, vector<8x8xbf16>, vector<8x8xf32> -> vector<8x8xf32>
    %85 = arith.addf %82, %84 : vector<8x8xf32>
    %c0_51 = arith.constant 0 : index
    %c16_52 = arith.constant 16 : index
    %86 = vector.load %arg17[%c0_51, %c16_52] : memref<8x32xf32, #tpu.memory_space<vmem>>, vector<8x8xf32>
    tpu.vector_store %arg17[%c0_51, %c16_52], %85 {strides = array<i32>} : memref<8x32xf32, #tpu.memory_space<vmem>>, vector<8x8xf32>,
    %c0_53 = arith.constant 0 : index
    %c2_54 = arith.constant 2 : index
    %87 = vector.load %arg15[%c0_53, %c2_54] : memref<8x4xf32, #tpu.memory_space<vmem>>, vector<8x1xf32>
    tpu.vector_store %arg15[%c0_53, %c2_54], %68 {strides = array<i32>} : memref<8x4xf32, #tpu.memory_space<vmem>>, vector<8x1xf32>,
    %c0_55 = arith.constant 0 : index
    %c24 = arith.constant 24 : index
    %88 = vector.load %arg14[%c0_55, %c24] : memref<8x32xbf16, #tpu.memory_space<vmem>>, vector<8x8xbf16>
    %89 = vector.extract_strided_slice %4 {offsets = [0, 24], sizes = [8, 8], strides = [1, 1]} : vector<8x32xbf16> to vector<8x8xbf16>
    %90 = vector.extract_strided_slice %6 {offsets = [0, 24], sizes = [8, 8], strides = [1, 1]} : vector<8x32xbf16> to vector<8x8xbf16>
    %cst_56 = arith.constant dense<0.000000e+00> : vector<8x8xf32>
    %91 = tpu.matmul %88, %89, %cst_56 {dimension_numbers = #tpu.dot_dimension_numbers<[1], [1], [0], [0], [0, 0, 1, 0], [], []>} : vector<8x8xbf16>, vector<8x8xbf16>, vector<8x8xf32> -> vector<8x8xf32>
    %c0_57 = arith.constant 0 : index
    %c3 = arith.constant 3 : index
    %92 = vector.load %arg15[%c0_57, %c3] : memref<8x4xf32, #tpu.memory_space<vmem>>, vector<8x1xf32>
    %cst_58 = arith.constant dense<0xFF800000> : vector<8xf32>
    %93 = vector.multi_reduction <maximumf>, %91, %cst_58 [1] : vector<8x8xf32> to vector<8xf32>
    %94 = vector.shape_cast %93 : vector<8xf32> to vector<8x1xf32>
    %95 = arith.maximumf %92, %94 : vector<8x1xf32>
    %96 = arith.subf %92, %95 : vector<8x1xf32>
    %97 = math.exp %96 : vector<8x1xf32>
    %98 = vector.broadcast %95 : vector<8x1xf32> to vector<8x8xf32>
    %99 = arith.subf %91, %98 : vector<8x8xf32>
    %100 = math.exp %99 : vector<8x8xf32>
    %c0_59 = arith.constant 0 : index
    %c3_60 = arith.constant 3 : index
    %101 = vector.load %arg16[%c0_59, %c3_60] : memref<8x4xf32, #tpu.memory_space<vmem>>, vector<8x1xf32>
    %102 = arith.mulf %97, %101 : vector<8x1xf32>
    %cst_61 = arith.constant dense<0.000000e+00> : vector<8xf32>
    %103 = vector.multi_reduction <add>, %100, %cst_61 [1] : vector<8x8xf32> to vector<8xf32>
    %104 = vector.shape_cast %103 : vector<8xf32> to vector<8x1xf32>
    %105 = arith.addf %102, %104 : vector<8x1xf32>
    %c0_62 = arith.constant 0 : index
    %c3_63 = arith.constant 3 : index
    %106 = vector.load %arg16[%c0_62, %c3_63] : memref<8x4xf32, #tpu.memory_space<vmem>>, vector<8x1xf32>
    tpu.vector_store %arg16[%c0_62, %c3_63], %105 {strides = array<i32>} : memref<8x4xf32, #tpu.memory_space<vmem>>, vector<8x1xf32>,
    %c0_64 = arith.constant 0 : index
    %c24_65 = arith.constant 24 : index
    %107 = vector.load %arg17[%c0_64, %c24_65] : memref<8x32xf32, #tpu.memory_space<vmem>>, vector<8x8xf32>
    %108 = vector.broadcast %97 : vector<8x1xf32> to vector<8x8xf32>
    %109 = arith.mulf %108, %107 : vector<8x8xf32>
    %110 = arith.truncf %100 : vector<8x8xf32> to vector<8x8xbf16>
    %cst_66 = arith.constant dense<0.000000e+00> : vector<8x8xf32>
    %111 = tpu.matmul %110, %90, %cst_66 {dimension_numbers = #tpu.dot_dimension_numbers<[1], [0], [0], [1], [0, 0, 1, 1], [], []>} : vector<8x8xbf16>, vector<8x8xbf16>, vector<8x8xf32> -> vector<8x8xf32>
    %112 = arith.addf %109, %111 : vector<8x8xf32>
    %c0_67 = arith.constant 0 : index
    %c24_68 = arith.constant 24 : index
    %113 = vector.load %arg17[%c0_67, %c24_68] : memref<8x32xf32, #tpu.memory_space<vmem>>, vector<8x8xf32>
    tpu.vector_store %arg17[%c0_67, %c24_68], %112 {strides = array<i32>} : memref<8x32xf32, #tpu.memory_space<vmem>>, vector<8x8xf32>,
    %c0_69 = arith.constant 0 : index
    %c3_70 = arith.constant 3 : index
    %114 = vector.load %arg15[%c0_69, %c3_70] : memref<8x4xf32, #tpu.memory_space<vmem>>, vector<8x1xf32>
    tpu.vector_store %arg15[%c0_69, %c3_70], %95 {strides = array<i32>} : memref<8x4xf32, #tpu.memory_space<vmem>>, vector<8x1xf32>,
    %c0_i32_71 = arith.constant 0 : i32
    %115 = arith.cmpi eq, %arg2, %c0_i32_71 : i32
    %116 = arith.extui %115 : i1 to i32
    %c0_i32_72 = arith.constant 0 : i32
    %117 = arith.cmpi ne, %116, %c0_i32_72 : i32
    scf.if %117 {
      %c0_73 = arith.constant 0 : index
      %c0_74 = arith.constant 0 : index
      %118 = vector.load %arg16[%c0_73, %c0_74] : memref<8x4xf32, #tpu.memory_space<vmem>>, vector<8x1xf32>
      %119 = tpu.reciprocal %118 {approx = true} : vector<8x1xf32> -> vector<8x1xf32>
      %c0_75 = arith.constant 0 : index
      %c0_76 = arith.constant 0 : index
      %120 = vector.load %arg17[%c0_75, %c0_76] : memref<8x32xf32, #tpu.memory_space<vmem>>, vector<8x8xf32>
      %121 = vector.broadcast %119 : vector<8x1xf32> to vector<8x8xf32>
      %122 = arith.mulf %120, %121 : vector<8x8xf32>
      %c0_77 = arith.constant 0 : index
      %c0_78 = arith.constant 0 : index
      %123 = vector.load %arg17[%c0_77, %c0_78] : memref<8x32xf32, #tpu.memory_space<vmem>>, vector<8x8xf32>
      tpu.vector_store %arg17[%c0_77, %c0_78], %122 {strides = array<i32>} : memref<8x32xf32, #tpu.memory_space<vmem>>, vector<8x8xf32>,
      %c0_79 = arith.constant 0 : index
      %c1_80 = arith.constant 1 : index
      %124 = vector.load %arg16[%c0_79, %c1_80] : memref<8x4xf32, #tpu.memory_space<vmem>>, vector<8x1xf32>
      %125 = tpu.reciprocal %124 {approx = true} : vector<8x1xf32> -> vector<8x1xf32>
      %c0_81 = arith.constant 0 : index
      %c8_82 = arith.constant 8 : index
      %126 = vector.load %arg17[%c0_81, %c8_82] : memref<8x32xf32, #tpu.memory_space<vmem>>, vector<8x8xf32>
      %127 = vector.broadcast %125 : vector<8x1xf32> to vector<8x8xf32>
      %128 = arith.mulf %126, %127 : vector<8x8xf32>
      %c0_83 = arith.constant 0 : index
      %c8_84 = arith.constant 8 : index
      %129 = vector.load %arg17[%c0_83, %c8_84] : memref<8x32xf32, #tpu.memory_space<vmem>>, vector<8x8xf32>
      tpu.vector_store %arg17[%c0_83, %c8_84], %128 {strides = array<i32>} : memref<8x32xf32, #tpu.memory_space<vmem>>, vector<8x8xf32>,
      %c0_85 = arith.constant 0 : index
      %c2_86 = arith.constant 2 : index
      %130 = vector.load %arg16[%c0_85, %c2_86] : memref<8x4xf32, #tpu.memory_space<vmem>>, vector<8x1xf32>
      %131 = tpu.reciprocal %130 {approx = true} : vector<8x1xf32> -> vector<8x1xf32>
      %c0_87 = arith.constant 0 : index
      %c16_88 = arith.constant 16 : index
      %132 = vector.load %arg17[%c0_87, %c16_88] : memref<8x32xf32, #tpu.memory_space<vmem>>, vector<8x8xf32>
      %133 = vector.broadcast %131 : vector<8x1xf32> to vector<8x8xf32>
      %134 = arith.mulf %132, %133 : vector<8x8xf32>
      %c0_89 = arith.constant 0 : index
      %c16_90 = arith.constant 16 : index
      %135 = vector.load %arg17[%c0_89, %c16_90] : memref<8x32xf32, #tpu.memory_space<vmem>>, vector<8x8xf32>
      tpu.vector_store %arg17[%c0_89, %c16_90], %134 {strides = array<i32>} : memref<8x32xf32, #tpu.memory_space<vmem>>, vector<8x8xf32>,
      %c0_91 = arith.constant 0 : index
      %c3_92 = arith.constant 3 : index
      %136 = vector.load %arg16[%c0_91, %c3_92] : memref<8x4xf32, #tpu.memory_space<vmem>>, vector<8x1xf32>
      %137 = tpu.reciprocal %136 {approx = true} : vector<8x1xf32> -> vector<8x1xf32>
      %c0_93 = arith.constant 0 : index
      %c24_94 = arith.constant 24 : index
      %138 = vector.load %arg17[%c0_93, %c24_94] : memref<8x32xf32, #tpu.memory_space<vmem>>, vector<8x8xf32>
      %139 = vector.broadcast %137 : vector<8x1xf32> to vector<8x8xf32>
      %140 = arith.mulf %138, %139 : vector<8x8xf32>
      %c0_95 = arith.constant 0 : index
      %c24_96 = arith.constant 24 : index
      %141 = vector.load %arg17[%c0_95, %c24_96] : memref<8x32xf32, #tpu.memory_space<vmem>>, vector<8x8xf32>
      tpu.vector_store %arg17[%c0_95, %c24_96], %140 {strides = array<i32>} : memref<8x32xf32, #tpu.memory_space<vmem>>, vector<8x8xf32>,
      %c0_97 = arith.constant 0 : index
      %c0_98 = arith.constant 0 : index
      %142 = vector.load %arg17[%c0_97, %c0_98] : memref<8x32xf32, #tpu.memory_space<vmem>>, vector<8x32xf32>
      %143 = arith.truncf %142 : vector<8x32xf32> to vector<8x32xbf16>
      %c0_99 = arith.constant 0 : index
      %c0_100 = arith.constant 0 : index
      %144 = vector.load %arg7[%c0_99, %c0_100] : memref<32x32xbf16, #tpu.memory_space<vmem>>, vector<32x32xbf16>
      %cst_101 = arith.constant dense<0.000000e+00> : vector<8x32xf32>
      %145 = tpu.matmul %143, %144, %cst_101 {dimension_numbers = #tpu.dot_dimension_numbers<[1], [0], [0], [1], [0, 0, 1, 1], [], []>} : vector<8x32xbf16>, vector<32x32xbf16>, vector<8x32xf32> -> vector<8x32xf32>
      %c0_102 = arith.constant 0 : index
      %c0_103 = arith.constant 0 : index
      %146 = vector.load %arg8[%c0_102, %c0_103] : memref<1x32xf32, #tpu.memory_space<vmem>>, vector<1x32xf32>
      %147 = vector.broadcast %146 : vector<1x32xf32> to vector<8x32xf32>
      %148 = arith.addf %145, %147 : vector<8x32xf32>
      %149 = arith.truncf %148 : vector<8x32xf32> to vector<8x32xbf16>
      %c0_104 = arith.constant 0 : index
      %c0_105 = arith.constant 0 : index
      %150 = vector.load %arg9[%c0_104, %c0_105] : memref<32x128xbf16, #tpu.memory_space<vmem>>, vector<32x128xbf16>
      %cst_106 = arith.constant dense<0.000000e+00> : vector<8x128xf32>
      %151 = tpu.matmul %149, %150, %cst_106 {dimension_numbers = #tpu.dot_dimension_numbers<[1], [0], [0], [1], [0, 0, 1, 1], [], []>} : vector<8x32xbf16>, vector<32x128xbf16>, vector<8x128xf32> -> vector<8x128xf32>
      %c0_107 = arith.constant 0 : index
      %c0_108 = arith.constant 0 : index
      %152 = vector.load %arg10[%c0_107, %c0_108] : memref<1x128xf32, #tpu.memory_space<vmem>>, vector<1x128xf32>
      %153 = vector.broadcast %152 : vector<1x128xf32> to vector<8x128xf32>
      %154 = arith.addf %151, %153 : vector<8x128xf32>
      %cst_109 = arith.constant 5.000000e-01 : f32
      %155 = vector.broadcast %cst_109 : f32 to vector<8x128xf32>
      %156 = arith.mulf %155, %154 : vector<8x128xf32>
      %cst_110 = arith.constant 0.707106769 : f32
      %157 = vector.broadcast %cst_110 : f32 to vector<8x128xf32>
      %158 = arith.mulf %154, %157 : vector<8x128xf32>
      %159 = math.erf %158 : vector<8x128xf32>
      %cst_111 = arith.constant 1.000000e+00 : f32
      %160 = vector.broadcast %cst_111 : f32 to vector<8x128xf32>
      %161 = arith.addf %160, %159 : vector<8x128xf32>
      %162 = arith.mulf %156, %161 : vector<8x128xf32>
      %163 = arith.truncf %162 : vector<8x128xf32> to vector<8x128xbf16>
      %c0_112 = arith.constant 0 : index
      %c0_113 = arith.constant 0 : index
      %164 = vector.load %arg11[%c0_112, %c0_113] : memref<128x32xbf16, #tpu.memory_space<vmem>>, vector<128x32xbf16>
      %cst_114 = arith.constant dense<0.000000e+00> : vector<8x32xf32>
      %165 = tpu.matmul %163, %164, %cst_114 {dimension_numbers = #tpu.dot_dimension_numbers<[1], [0], [0], [1], [0, 0, 1, 1], [], []>} : vector<8x128xbf16>, vector<128x32xbf16>, vector<8x32xf32> -> vector<8x32xf32>
      %c0_115 = arith.constant 0 : index
      %c0_116 = arith.constant 0 : index
      %166 = vector.load %arg12[%c0_115, %c0_116] : memref<1x32xf32, #tpu.memory_space<vmem>>, vector<1x32xf32>
      %167 = vector.broadcast %166 : vector<1x32xf32> to vector<8x32xf32>
      %168 = arith.addf %165, %167 : vector<8x32xf32>
      %169 = arith.addf %168, %148 : vector<8x32xf32>
      %c0_117 = arith.constant 0 : index
      %c0_118 = arith.constant 0 : index
      %c0_119 = arith.constant 0 : index
      %170 = vector.load %arg13[%c0_117, %c0_118, %c0_119] : memref<1x8x32xf32, #tpu.memory_space<vmem>>, vector<1x8x32xf32>
      %171 = vector.shape_cast %170 : vector<1x8x32xf32> to vector<8x32xf32>
      %172 = vector.shape_cast %169 : vector<8x32xf32> to vector<1x8x32xf32>
      tpu.vector_store %arg13[%c0_117, %c0_118, %c0_119], %172 {strides = array<i32>} : memref<1x8x32xf32, #tpu.memory_space<vmem>>, vector<1x8x32xf32>,
    } else {
    }
    return
  }
  func.func @transform_0(%arg0: i32, %arg1: i32, %arg2: i32) -> (i32, i32, i32) {
    %c0_i32 = arith.constant 0 : i32
    %c0_i32_0 = arith.constant 0 : i32
    return %arg0, %arg1, %c0_i32 : i32, i32, i32
  }
  func.func @transform_1(%arg0: i32, %arg1: i32, %arg2: i32) -> (i32, i32, i32) {
    %c0_i32 = arith.constant 0 : i32
    %c0_i32_0 = arith.constant 0 : i32
    return %arg0, %arg2, %c0_i32 : i32, i32, i32
  }
  func.func @transform_2(%arg0: i32, %arg1: i32, %arg2: i32) -> (i32, i32, i32) {
    %c0_i32 = arith.constant 0 : i32
    %c0_i32_0 = arith.constant 0 : i32
    return %arg0, %arg2, %c0_i32 : i32, i32, i32
  }
  func.func @transform_3(%arg0: i32, %arg1: i32, %arg2: i32) -> (i32, i32) {
    %c0_i32 = arith.constant 0 : i32
    %c0_i32_0 = arith.constant 0 : i32
    %c0_i32_1 = arith.constant 0 : i32
    return %c0_i32, %c0_i32_0 : i32, i32
  }
  func.func @transform_4(%arg0: i32, %arg1: i32, %arg2: i32) -> (i32, i32) {
    %c0_i32 = arith.constant 0 : i32
    %c0_i32_0 = arith.constant 0 : i32
    %c0_i32_1 = arith.constant 0 : i32
    return %c0_i32, %c0_i32_0 : i32, i32
  }
  func.func @transform_5(%arg0: i32, %arg1: i32, %arg2: i32) -> (i32, i32) {
    %c0_i32 = arith.constant 0 : i32
    %c0_i32_0 = arith.constant 0 : i32
    %c0_i32_1 = arith.constant 0 : i32
    return %c0_i32, %c0_i32_0 : i32, i32
  }
  func.func @transform_6(%arg0: i32, %arg1: i32, %arg2: i32) -> (i32, i32) {
    %c0_i32 = arith.constant 0 : i32
    %c0_i32_0 = arith.constant 0 : i32
    %c0_i32_1 = arith.constant 0 : i32
    return %c0_i32, %c0_i32_0 : i32, i32
  }
  func.func @transform_7(%arg0: i32, %arg1: i32, %arg2: i32) -> (i32, i32) {
    %c0_i32 = arith.constant 0 : i32
    %c0_i32_0 = arith.constant 0 : i32
    %c0_i32_1 = arith.constant 0 : i32
    return %c0_i32, %c0_i32_0 : i32, i32
  }
  func.func @transform_8(%arg0: i32, %arg1: i32, %arg2: i32) -> (i32, i32) {
    %c0_i32 = arith.constant 0 : i32
    %c0_i32_0 = arith.constant 0 : i32
    %c0_i32_1 = arith.constant 0 : i32
    return %c0_i32, %c0_i32_0 : i32, i32
  }
  func.func @transform_9(%arg0: i32, %arg1: i32, %arg2: i32) -> (i32, i32) {
    %c0_i32 = arith.constant 0 : i32
    %c0_i32_0 = arith.constant 0 : i32
    %c0_i32_1 = arith.constant 0 : i32
    return %c0_i32, %c0_i32_0 : i32, i32
  }
  func.func @transform_10(%arg0: i32, %arg1: i32, %arg2: i32) -> (i32, i32, i32) {
    %c0_i32 = arith.constant 0 : i32
    %c0_i32_0 = arith.constant 0 : i32
    return %arg0, %arg1, %c0_i32 : i32, i32, i32
  }
}

</mosaic_0001>

<bundles_post_ra>
// kernel: tpu_custom_call.1
= control target key start
LH: loop header
LB: loop body
LE: loop exit
PB: predicated region body
PF: predicated region fallthrough
CT: control target
= control target key end

     0   :  { %s2292_s0 = inlined_call_operand.vmem [shape: bf16[2,8,32], index: 0, kind: input, shape index: {}]   ;;  %s2293_s1 = inlined_call_operand.vmem [shape: bf16[2,8,32], index: 1, kind: input, shape index: {}]   ;;  %s2294_s2 = inlined_call_operand.vmem [shape: bf16[2,8,32], index: 2, kind: input, shape index: {}]   ;;  %s2295_s3 = inlined_call_operand.vmem [shape: bf16[32,32], index: 3, kind: input, shape index: {}]   ;;  %s2296_s4 = inlined_call_operand.vmem [shape: bf16[32,32], index: 4, kind: input, shape index: {}]   ;;  %s2297_s5 = inlined_call_operand.vmem [shape: f32[1,32], index: 5, kind: input, shape index: {}]   ;;  %s2298_s6 = inlined_call_operand.vmem [shape: bf16[32,128], index: 6, kind: input, shape index: {}]   ;;  %s2299_s7 = inlined_call_operand.vmem [shape: f32[1,128], index: 7, kind: input, shape index: {}]   ;;  %s2300_s8 = inlined_call_operand.vmem [shape: bf16[128,32], index: 8, kind: input, shape index: {}]   ;;  %s2301_s9 = inlined_call_operand.vmem [shape: f32[1,32], index: 9, kind: input, shape index: {}]   ;;  %s2302_s10 = inlined_call_operand.hbm [shape: f32[2,8,32], index: 10, kind: output, shape index: {}]  }
   0x1   :  { %2303 = sst [smem:[#allocation9_spill]] %s2292_s0 }
   0x2   :  { %15 = vsyncpa [#allocation7], 0 }
   0x3   :  { %17 = vsyncpa [#allocation7 + $0x1], 0  ;;  %s1939_s13 = smov 0   ;;  %s1941_s14 = smov 0  }
   0x4   :  { %s1943_s15 = smov 0   ;;  %s1945_s16 = smov 0  }
   0x5   :  { %s1947_s17 = smov 0   ;;  %s1949_s18 = smov 0  }
   0x6 LB: > { %s1498_s19 = sadd.s32 4294967295, %s1868_s18   ;;  %s1499_s20 = sadd.s32 4294967294, %s1868_s18   ;;  %s1868_s18 = sphi %s1949_s18, %s23_s18   ;;  %s1864_s17 = sphi %s1947_s17, %s2311_s17   ;;  %s1860_s16 = sphi %s1945_s16, %s2310_s16   ;;  %s1856_s15 = sphi %s1943_s15, %s2309_s15   ;;  %s1852_s14 = sphi %s1941_s14, %s2308_s14   ;;  %s1848_s13 = sphi %s1939_s13, %s2307_s13  }
   0x7   : > { %s42_s21 = sadd.s32 1, %s1864_s17  ;;  %s282_s22 = sadd.s32 1, %s1856_s15 }
   0x8   : > { %p44_p0 = scmp.ge.s32.totalorder %s42_s21, 2  ;;  %p292_p1 = scmp.ne.s32.totalorder %s1856_s15, %s1852_s14 }
   0x9   : > { %p293_p2 = scmp.eq.s32.totalorder %s1498_s19, 1  ;;  %p298_p3 = scmp.ne.s32.totalorder %s1852_s14, %s1848_s13 }
   0xa   : > { %s2313_s21 = smov (%p44_p0, %s42_s21), 0  ;;  %p299_p5 = scmp.eq.s32.totalorder %s1499_s20, 1 }
   0xb   : > { %p1979_p4 = por %p293_p2, %p292_p1  ;;  %s277_s24 = ssub.s32 %s1864_s17, %s2313_s21 }
   0xc   : > { %p1502_p6 = scmp.ge.s32.totalorder %s1868_s18, 1  ;;  %p280_p7 = scmp.eq.s32.totalorder %s277_s24, 0 }
   0xd   : > { %p1986_p8 = por %p299_p5, %p298_p3  ;;  %p368_p9 = scmp.lt.s32.totalorder %s1868_s18, 3 }
   0xe   : > { %s1992_s26 = scalar_select %p280_p7, %s1856_s15, %s282_s22  }
   0xf   : > { %p369_p10 = pnand %p1502_p6, %p368_p9 }
  0x10   : > { %v1751_v0 = vld [vmem:[%s2295_s3] sm:$0xff] (!%p369_p10)   ;;  %v1870_v1 = vmov (!%p369_p10), 0.0   ;;  %v1752_v2 = vld [vmem:[%s2295_s3 + $0x8] sm:$0xff] (!%p369_p10)   ;;  %vm1871_vm0 = vmmov (!%p369_p10), 0   ;;  %p422_p11 = scmp.lt.s32.totalorder (!%p369_p10), %s1860_s16, 1  ;;  %vm465_vm1 = vcmask (!%p369_p10), 261120  }
  0x11   : > { %372 = sbr.rel (%p369_p10) target bundleno = 1964 (0x7ac), region = 60  ;;  %1578 = vmatprep.subr.bf16.mxu0 (!%p369_p10), %v1870_v1  ;;  %1598 = vmatprep.subr.bf16.mxu1 (!%p369_p10), %v1870_v1  ;;  %516 = vst.msk [vmem:[#allocation5] sm:$0xff] (!%p369_p10), %vm465_vm1, %v1870_v1  ;;  %s2306_s0 = sld [smem:[#allocation9_spill]] (!%p369_p10)  ;;  %vm520_vm2 = vcmask (!%p369_p10), 64512   ;;  %vm511_vm3 = vcmask (!%p369_p10), 257024   ;;  %vm513_vm4 = vcmask (!%p369_p10), 31744  }
  0x12   : > { %1579 = vmatpush3.bf16.msra.mxu0 (!%p369_p10), %v1751_v0  ;;  %1582 = vmatprep.mubr.msk.bf16.mxu0 (!%p369_p10), %vm1871_vm0, %v1870_v1  ;;  %s1872_s29 = smov (!%p369_p10), 120   ;;  %s1873_s30 = smov (!%p369_p10), 112   ;;  %v1875_v31 = vmov (!%p369_p10), -inf   ;;  %515 = vst.msk [vmem:[#allocation4] sm:$0xff] (!%p369_p10), %vm513_vm4, %v1870_v1  ;;  %v1876_v32 = vmov (!%p369_p10), 0   ;;  %v1877_v48 = vmov (!%p369_p10), 1  }
  0x13   : > { %1580 = vmatprep.subr.bf16.mxu0 (!%p369_p10), %v1870_v1  ;;  %1600 = vmatprep.mubr.msk.bf16.mxu1 (!%p369_p10), %vm1871_vm0, %v1870_v1  ;;  %514 = vst.msk [vmem:[#allocation3] sm:$0xff] (!%p369_p10), %vm513_vm4, %v1875_v31  ;;  %vm589_vm5 = vcmask (!%p369_p10), 7168   ;;  %v1878_v53 = vmov (!%p369_p10), 2   ;;  %vm602_vm6 = vcmask (!%p369_p10), 1043456   ;;  %vm728_vm7 = vcmask (!%p369_p10), 15368   ;;  %s1881_s24 = smov (!%p369_p10), 16  }
  0x14   : > { %1738 = vset.pattern.permute.xlu1 (!%p369_p10), %v1876_v32  ;;  %1739 = vset.pattern.permute.xlu0 (!%p369_p10), %v1877_v48  ;;  %vm873_vm8 = vcmask (!%p369_p10), 23568   ;;  %vm1015_vm9 = vcmask (!%p369_p10), 31768   ;;  %s1882_s27 = smov (!%p369_p10), 24   ;;  %vm794_vm10 = vcmask (!%p369_p10), 130112   ;;  %vm936_vm11 = vcmask (!%p369_p10), 195712  }
  0x15   : > { %vm1078_vm12 = vcmask (!%p369_p10), 261312  }
  0x16   : > { %1581 = vmatpush3.bf16.msra.mxu0 (!%p369_p10), %v1752_v2 }
  0x17   : > { %1586 = vmatprep.subr.bf16.mxu0 (!%p369_p10), %v1870_v1 }
  0x18   : > { %s423_s11 = scalar_select %p422_p11, %s1860_s16, 1 }
  0x1a   : > { %s2011_s12 = sshll.u32 %s423_s11, 2  ;;  %s1874_s11 = smov 104   ;;  %v2070_v49 = vld [vmem:[#allocation3] sm:$0xff] }
  0x1b   : > { %s428_s22 = scalar_lea.vmem %s2306_s0, %s2011_s12  ;;  %s435_s28 = scalar_lea.vmem %s2293_s1, %s2011_s12 }
  0x1c   : > { %v448_v3 = vld [vmem:[%s428_s22] sm:$0xf]  ;;  %s442_s22 = scalar_lea.vmem %s2294_s2, %s2011_s12  ;;  %s1880_s12 = smov 8  }
  0x1d   : > { %1583 = vmatmul.mubr.msk.bf16.vlgmr.msra.gmra.mrb[0].mxu0 %vm465_vm1, %v448_v3  ;;  %v517_v4 = vld [vmem:[%s435_s28] sm:$0xf]  ;;  %s1883_s28 = smov [#allocation6]  }
  0x1e   : > { %1588 = vmatprep.mubr.msk.bf16.mxu0 %vm1871_vm0, %v1870_v1  ;;  %v1513_v5 = vcombine.low %v517_v4, %v517_v4  ;;  %v525_v6 = vsel %vm520_vm2, %v517_v4, 0  ;;  %v518_v54 = vld [vmem:[%s442_s22] sm:$0xf] }
  0x1f   : > { %1587 = vmatpush3.bf16.xpose.msra.mxu0 %v525_v6  ;;  %v604_v55 = vsel %vm602_vm6, %v518_v54, 0  ;;  %v1515_v2 = vcombine.low %v518_v54, %v518_v54 }
  0x20   : > { %658 = vrot.lane.b32.xlu0 %v1513_v5, %s1872_s29  ;;  %803 = vrot.lane.b32.xlu1 %v1513_v5, %s1873_s30 }
  0x21   : > { %1592 = vmatprep.subr.bf16.mxu0 %v1870_v1 }
  0x92   : > { %v659_v7 = vpop.permute.xlu0 %658  ;;  %v804_v19 = vpop.permute.xlu1 %803 }
  0x93   : > { %v664_v8 = vsel %vm520_vm2, %v659_v7, 0  ;;  %v809_v20 = vsel %vm520_vm2, %v804_v19, 0 }
  0x94   : > { %1599 = vmatpush3.bf16.xpose.msra.mxu1 %v664_v8 }
  0x95   : > { %1610 = vmatprep.subr.bf16.mxu1 %v1870_v1 }
  0xf0   : > { %v503_v9 = vpop.f32.mrb[0].mxu0 }
  0xf1   : > { %v509_v10 = vmul.f32 0.35355338, %v503_v9  ;;  %v1584_v11 = vpop.f32.mrb[1].mxu0 }
  0xf2   : > { %v506_v12 = vpop.f32.mrb[2].mxu0 }
  0xf3   : > { %v510_v13 = vpack.c.bf16 %v509_v10, %v509_v10  ;;  %v1585_v14 = vpop.f32.mrb[3].mxu0 }
  0xf5   : > { %512 = vst.msk [vmem:[#allocation2] sm:$0xf] %vm511_vm3, %v510_v13 }
  0xfc   : > { %v519_v15 = vld [vmem:[#allocation2] sm:$0xf] }
  0xfd   : > { %v1754_v16 = vld [vmem:[#allocation2] ss:$0 sps:$4 sm:$0xff]   ;;  %1589 = vmatmul.mubr.msk.bf16.vlgmr.msra.gmra.mrb[4].mxu0 %vm520_vm2, %v519_v15 }
  0xfe   : > { %v1755_v17 = vld [vmem:[#allocation2] ss:$0 sps:$4 sm:$0xff]   ;;  %801 = vrot.lane.b32.xlu1 %v1754_v16, %s1873_s30  ;;  %1594 = vmatprep.mubr.msk.bf16.mxu0 %vm1871_vm0, %v1870_v1 }
  0xff   : > { %653 = vrot.lane.b32.xlu0 %v1755_v17, %s1872_s29  ;;  %v1756_v18 = vld [vmem:[#allocation2] ss:$0 sps:$4 sm:$0xff]   ;;  %1593 = vmatpush3.bf16.msra.mxu0 %v604_v55 }
 0x100   : > { %1604 = vmatprep.subr.bf16.mxu0 %v1870_v1 }
 0x102   : > { %943 = vrot.lane.b32.xlu1 %v1756_v18, %s1874_s11 }
 0x103   : > { %945 = vrot.lane.b32.xlu0 %v1513_v5, %s1874_s11  ;;  %v1879_v5 = vmov 3  }
 0x170   : > { %v802_v24 = vpop.permute.xlu1 %801 }
 0x171   : > { %v654_v21 = vpop.permute.xlu0 %653 }
 0x172   : > { %1601 = vmatmul.mubr.msk.bf16.vlgmr.msra.gmra.mrb[0].mxu1 %vm520_vm2, %v654_v21 }
 0x173   : > { %1611 = vmatpush3.bf16.xpose.msra.mxu1 %v809_v20  ;;  %1612 = vmatprep.mubr.msk.bf16.mxu1 %vm1871_vm0, %v1870_v1 }
 0x174   : > { %1622 = vmatprep.subr.bf16.mxu1 %v1870_v1  ;;  %v944_v25 = vpop.permute.xlu1 %943 }
 0x175   : > { %v946_v22 = vpop.permute.xlu0 %945 }
 0x176   : > { %v951_v23 = vsel %vm520_vm2, %v946_v22, 0 }
 0x17a   : > { %1613 = vmatmul.mubr.msk.bf16.vlgmr.msra.gmra.mrb[4].mxu1 %vm520_vm2, %v802_v24 }
 0x17b   : > { %1623 = vmatpush3.bf16.xpose.msra.mxu1 %v951_v23  ;;  %1624 = vmatprep.mubr.msk.bf16.mxu1 %vm1871_vm0, %v1870_v1 }
 0x17c   : > { %1634 = vmatprep.subr.bf16.mxu1 %v1870_v1 }
 0x182   : > { %1625 = vmatmul.mubr.msk.bf16.vlgmr.msra.gmra.mrb[8].mxu1 %vm520_vm2, %v944_v25 }
 0x183   : > { %1638 = vmatprep.mubr.msk.bf16.mxu1 %vm1871_vm0, %v1870_v1 }
 0x1d0   : > { %v2051_v26 = vpop.f32.mrb[4].mxu0 }
 0x1d1   : > { %v1590_v27 = vpop.f32.mrb[5].mxu0  ;;  %v568_v28 = vsel %vm520_vm2, %v2051_v26, -inf }
 0x1d2   : > { %569 = vmax.xlane.f32.xlu0 %v568_v28  ;;  %v564_v29 = vpop.f32.mrb[6].mxu0 }
 0x1d3   : > { %v1591_v30 = vpop.f32.mrb[7].mxu0 }
 0x245   : > { %v2057_v33 = vpop.f32.mrb[0].mxu1 }
 0x246   : > { %v1602_v34 = vpop.f32.mrb[1].mxu1  ;;  %v707_v35 = vsel %vm520_vm2, %v2057_v33, -inf }
 0x247   : > { %708 = vmax.xlane.f32.xlu1 %v707_v35  ;;  %v703_v36 = vpop.f32.mrb[2].mxu1 }
 0x248   : > { %v1603_v37 = vpop.f32.mrb[3].mxu1 }
 0x24d   : > { %v2061_v38 = vpop.f32.mrb[4].mxu1 }
 0x24e   : > { %v1614_v39 = vpop.f32.mrb[5].mxu1  ;;  %v852_v40 = vsel %vm520_vm2, %v2061_v38, -inf }
 0x24f   : > { %v848_v41 = vpop.f32.mrb[6].mxu1  ;;  %853 = vmax.xlane.f32.xlu0 %v852_v40 }
 0x250   : > { %v1615_v42 = vpop.f32.mrb[7].mxu1 }
 0x251   : > { %v583_v42 = vld [vmem:[#allocation4] sm:$0xff] }
 0x255   : > { %v2065_v43 = vpop.f32.mrb[8].mxu1 }
 0x256   : > { %v1626_v44 = vpop.f32.mrb[9].mxu1  ;;  %v994_v45 = vsel %vm520_vm2, %v2065_v43, -inf }
 0x257   : > { %v990_v46 = vpop.f32.mrb[10].mxu1  ;;  %995 = vmax.xlane.f32.xlu0 %v994_v45 }
 0x258   : > { %v1627_v47 = vpop.f32.mrb[11].mxu1 }
 0x25f   : > { %v570_v50 = vpop.xlane.xlu0 %569 }
 0x260   : > { %v2073_v51 = vmax.f32 %v2070_v49, %v570_v50 }
 0x262   : > { %v572_v52 = vsub.f32 %v2070_v49, %v2073_v51  ;;  %648 = vst.msk [vmem:[#allocation3] sm:$0xff] %vm589_vm5, %v2073_v51  ;;  %577 = vperm.xlu1 %1738, %v2073_v51  }
 0x264   : > { %v573_v27 = vmul.f32 1.442695, %v572_v52 }
 0x266   : > { %1740 = vset.pattern.permute.xlu1 %v1878_v53 }
 0x269   : > { %v2087_v57 = vld [vmem:[#allocation3] sm:$0xff] }
 0x2d4   : > { %v709_v56 = vpop.xlane.xlu1 %708 }
 0x2d5   : > { %v2090_v58 = vmax.f32 %v2087_v57, %v709_v56  ;;  %v591_v56 = vld [vmem:[#allocation5] sm:$0xff] }
 0x2d7   : > { %v711_v59 = vsub.f32 %v2087_v57, %v2090_v58  ;;  %796 = vst.msk [vmem:[#allocation3] sm:$0xff] %vm728_vm7, %v2090_v58  ;;  %716 = vperm.xlu0 %1739, %v2090_v58  }
 0x2d9   : > { %v712_v40 = vmul.f32 1.442695, %v711_v59 }
 0x2db   : > { %1742 = vset.pattern.permute.xlu0 %v1876_v32 }
 0x2dc   : > { %v854_v61 = vpop.xlane.xlu0 %853 }
 0x2de   : > { %v2098_v60 = vld [vmem:[#allocation3] sm:$0xff] }
 0x2df   : > { %v2101_v62 = vmax.f32 %v2098_v60, %v854_v61 }
 0x2e1   : > { %v856_v63 = vsub.f32 %v2098_v60, %v2101_v62  ;;  %938 = vst.msk [vmem:[#allocation3] sm:$0xff] %vm873_vm8, %v2101_v62  ;;  %v578_v0 = vpop.permute.xlu1 %577  ;;  %861 = vperm.xlu1 %1740, %v2101_v62  }
 0x2e2   : > { %v580_v3 = vsub.f32 %v2051_v26, %v578_v0 }
 0x2e3   : > { %v857_v51 = vmul.f32 1.442695, %v856_v63 }
 0x2e4   : > { %v581_v4 = vmul.f32 1.442695, %v580_v3  ;;  %v996_v7 = vpop.xlane.xlu0 %995 }
 0x2e5   : > { %741 = vrot.lane.b32.xlu1 %v1515_v2, %s1872_s29  ;;  %s1794_s29 = sshll.u32 %s1883_s28, 4  ;;  %s1795_s29 = int_to_ptr.vmem [resolvable:$false] %s1794_s29 }
 0x2e6   : > { %1770 = vpow2.f32 %v581_v4  ;;  %1741 = vset.pattern.permute.xlu1 %v1879_v5  ;;  %s1796_s0 = scalar_lea.vmem %s1795_s29, 256 }
 0x2e8   : > { %v2111_v6 = vld [vmem:[#allocation3] sm:$0xff] }
 0x2e9   : > { %v2114_v8 = vmax.f32 %v2111_v6, %v996_v7 }
 0x2eb   : > { %v998_v9 = vsub.f32 %v2111_v6, %v2114_v8  ;;  %1080 = vst.msk [vmem:[#allocation3] sm:$0xff] %vm1015_vm9, %v2114_v8  ;;  %1003 = vperm.xlu1 %1741, %v2114_v8  }
 0x2ed   : > { %v999_v57 = vmul.f32 1.442695, %v998_v9 }
 0x2ef   : > { %883 = vrot.lane.b32.xlu1 %v1515_v2, %s1873_s30  ;;  %s1541_s30 = sshll.u32 %s1860_s16, 7 }
 0x2f0   : > { %v1771_v10 = vpop.eup %1770  ;;  %1743 = vset.pattern.permute.xlu1 %v1877_v48 }
 0x2f1   : > { %v598_v11 = vpack.c.bf16 %v1771_v10, %v1771_v10  ;;  %v585_v12 = vsel %vm520_vm2, %v1771_v10, 0.0 }
 0x2f3   : > { %1595 = vmatmul.mubr.msk.bf16.vlgmr.msra.gmra.mrb[8].mxu0 %vm520_vm2, %v598_v11  ;;  %1025 = vrot.lane.b32.xlu1 %v1515_v2, %s1874_s11 }
 0x2f4   : > { %1606 = vmatprep.mubr.msk.bf16.mxu0 %vm1871_vm0, %v1870_v1 }
 0x317   : > { %586 = vadd.xlane.f32.xlu1 %v585_v12 }
 0x356   : > { %v717_v13 = vpop.permute.xlu0 %716 }
 0x357   : > { %v719_v14 = vsub.f32 %v2057_v33, %v717_v13 }
 0x359   : > { %v720_v15 = vmul.f32 1.442695, %v719_v14 }
 0x35b   : > { %1772 = vpow2.f32 %v720_v15 }
 0x360   : > { %v862_v16 = vpop.permute.xlu1 %861 }
 0x361   : > { %v864_v17 = vsub.f32 %v2061_v38, %v862_v16 }
 0x363   : > { %v865_v18 = vmul.f32 1.442695, %v864_v17 }
 0x364   : > { %v742_v19 = vpop.permute.xlu1 %741 }
 0x365   : > { %v1773_v20 = vpop.eup %1772  ;;  %1774 = vpow2.f32 %v865_v18  ;;  %v747_v21 = vsel %vm602_vm6, %v742_v19, 0 }
 0x366   : > { %1605 = vmatpush3.bf16.msra.mxu0 %v747_v21  ;;  %v724_v22 = vsel %vm520_vm2, %v1773_v20, 0.0  ;;  %v737_v23 = vpack.c.bf16 %v1773_v20, %v1773_v20 }
 0x367   : > { %725 = vadd.xlane.f32.xlu0 %v724_v22  ;;  %1616 = vmatprep.subr.bf16.mxu0 %v1870_v1 }
 0x369   : > { %1607 = vmatmul.mubr.msk.bf16.vlgmr.msra.gmra.mrb[12].mxu0 %vm520_vm2, %v737_v23  ;;  %v1758_v23 = vld [vmem:[%s2296_s4] sm:$0xff]  }
 0x36a   : > { %v1004_v24 = vpop.permute.xlu1 %1003  ;;  %1618 = vmatprep.mubr.msk.bf16.mxu0 %vm1871_vm0, %v1870_v1  ;;  %1635 = vmatpush3.bf16.msra.mxu1 %v1758_v23 }
 0x36b   : > { %v1006_v25 = vsub.f32 %v2065_v43, %v1004_v24  ;;  %1636 = vmatprep.subr.bf16.mxu1 %v1870_v1 }
 0x36d   : > { %v1007_v26 = vmul.f32 1.442695, %v1006_v25 }
 0x36e   : > { %v884_v28 = vpop.permute.xlu1 %883 }
 0x36f   : > { %v1775_v29 = vpop.eup %1774  ;;  %1776 = vpow2.f32 %v1007_v26  ;;  %v889_v30 = vsel %vm602_vm6, %v884_v28, 0 }
 0x370   : > { %1617 = vmatpush3.bf16.msra.mxu0 %v889_v30  ;;  %v869_v31 = vsel %vm520_vm2, %v1775_v29, 0.0  ;;  %v882_v33 = vpack.c.bf16 %v1775_v29, %v1775_v29  ;;  %1778 = vpow2.f32 %v573_v27 }
 0x371   : > { %870 = vadd.xlane.f32.xlu1 %v869_v31  ;;  %1628 = vmatprep.subr.bf16.mxu0 %v1870_v1  ;;  %1780 = vpow2.f32 %v712_v40 }
 0x372   : > { %v1026_v34 = vpop.permute.xlu1 %1025  ;;  %1782 = vpow2.f32 %v857_v51 }
 0x373   : > { %1619 = vmatmul.mubr.msk.bf16.vlgmr.msra.gmra.mrb[16].mxu0 %vm520_vm2, %v882_v33  ;;  %v1031_v35 = vsel %vm602_vm6, %v1026_v34, 0  ;;  %1784 = vpow2.f32 %v999_v57  ;;  %v1764_v57 = vld [vmem:[%s2300_s8 + $0x10] sm:$0xff]  }
 0x374   : > { %1629 = vmatpush3.bf16.msra.mxu0 %v1031_v35  ;;  %1630 = vmatprep.mubr.msk.bf16.mxu0 %vm1871_vm0, %v1870_v1 }
 0x375   : > { %1642 = vmatprep.subr.bf16.mxu0 %v1870_v1 }
 0x379   : > { %v1777_v36 = vpop.eup %1776 }
 0x37a   : > { %v1011_v37 = vsel %vm520_vm2, %v1777_v36, 0.0  ;;  %v1024_v38 = vpack.c.bf16 %v1777_v36, %v1777_v36  ;;  %v1779_v39 = vpop.eup %1778 }
 0x37b   : > { %1012 = vadd.xlane.f32.xlu1 %v1011_v37  ;;  %v1781_v41 = vpop.eup %1780  ;;  %v584_v43 = vmul.f32 %v1779_v39, %v583_v42 }
 0x37c   : > { %1631 = vmatmul.mubr.msk.bf16.vlgmr.msra.gmra.mrb[20].mxu0 %vm520_vm2, %v1024_v38  ;;  %v1783_v61 = vpop.eup %1782 }
 0x37d   : > { %594 = vperm.xlu0 %1742, %v1779_v39   ;;  %1646 = vmatprep.mubr.msk.bf16.mxu0 %vm1871_vm0, %v1870_v1  ;;  %v1785_v63 = vpop.eup %1784 }
 0x381   : > { %1747 = vset.pattern.permute.xlu0 %v1877_v48 }
 0x38c   : > { %733 = vperm.xlu1 %1743, %v1781_v41  }
 0x390   : > { %1744 = vset.pattern.permute.xlu1 %v1878_v53 }
 0x3a4   : > { %v587_v44 = vpop.xlane.xlu1 %586 }
 0x3a5   : > { %v588_v45 = vadd.f32 %v587_v44, %v584_v43 }
 0x3a7   : > { %590 = vst.msk [vmem:[#allocation4] sm:$0xff] %vm589_vm5, %v588_v45 }
 0x3ae   : > { %v722_v52 = vld [vmem:[#allocation4] sm:$0xff] }
 0x3af   : > { %v723_v48 = vmul.f32 %v1781_v41, %v722_v52 }
 0x3c6   : > { %v640_v46 = vpop.f32.mrb[8].mxu0 }
 0x3c7   : > { %v1596_v47 = vpop.f32.mrb[9].mxu0 }
 0x3c8   : > { %v643_v49 = vpop.f32.mrb[10].mxu0 }
 0x3c9   : > { %v1597_v50 = vpop.f32.mrb[11].mxu0 }
 0x3f4   : > { %v726_v54 = vpop.xlane.xlu0 %725 }
 0x3f5   : > { %v727_v55 = vadd.f32 %v726_v54, %v723_v48  ;;  %v1761_v54 = vld [vmem:[%s2298_s6 + $0x8] sm:$0xff]  }
 0x3f7   : > { %729 = vst.msk [vmem:[#allocation4] sm:$0xff] %vm728_vm7, %v727_v55  ;;  %v1762_v55 = vld [vmem:[%s2300_s8] sm:$0xff]  }
 0x3fc   : > { %v595_v58 = vpop.permute.xlu0 %594 }
 0x3fd   : > { %v597_v59 = vmul.f32 %v595_v58, %v591_v56  ;;  %v1763_v56 = vld [vmem:[%s2300_s8 + $0x8] sm:$0xff]   ;;  %v1523_v58 = vld [vmem:[%s2297_s5] ss:$0 sm:$0xff] }
 0x3fe   : > { %v867_v0 = vld [vmem:[#allocation4] sm:$0xff]  ;;  %v871_v60 = vpop.xlane.xlu1 %870 }
 0x3ff   : > { %v646_v2 = vadd.f32 %v640_v46, %v597_v59  ;;  %v868_v3 = vmul.f32 %v1783_v61, %v867_v0 }
 0x401   : > { %647 = vst.msk [vmem:[#allocation5] sm:$0xff] %vm520_vm2, %v646_v2  ;;  %v872_v62 = vadd.f32 %v871_v60, %v868_v3 }
 0x403   : > { %874 = vst.msk [vmem:[#allocation4] sm:$0xff] %vm873_vm8, %v872_v62  ;;  %v1765_v62 = vld [vmem:[%s2300_s8 + $0x18] sm:$0xff]  }
 0x408   : > { %v1013_v10 = vpop.xlane.xlu1 %1012  ;;  %v730_v24 = vld [vmem:[#allocation5] sm:$0xff] }
 0x40a   : > { %v1009_v4 = vld [vmem:[#allocation4] sm:$0xff] }
 0x40b   : > { %v1010_v7 = vmul.f32 %v1785_v63, %v1009_v4  ;;  %v1767_v4 = vld [vmem:[%s2300_s8 + $0x28] sm:$0xff]  }
 0x40d   : > { %v1014_v11 = vadd.f32 %v1013_v10, %v1010_v7  ;;  %v1768_v7 = vld [vmem:[%s2300_s8 + $0x30] sm:$0xff]   ;;  %v1769_v10 = vld [vmem:[%s2300_s8 + $0x38] sm:$0xff]  }
 0x40f   : > { %1016 = vst.msk [vmem:[#allocation4] sm:$0xff] %vm1015_vm9, %v1014_v11  ;;  %v1527_v11 = vld [vmem:[%s2299_s7] ss:$0 sm:$0xff] }
 0x416   : > { %v1094_v6 = vld [vmem:[#allocation4] sm:$0xff] }
 0x417   : > { %1786 = vrcp.f32 %v1094_v6 }
 0x421   : > { %v1787_v8 = vpop.eup %1786 }
 0x422   : > { %1099 = vperm.xlu0 %1747, %v1787_v8  }
 0x426   : > { %1750 = vset.pattern.permute.xlu0 %v1879_v5 }
 0x43c   : > { %v783_v9 = vpop.f32.mrb[12].mxu0 }
 0x43d   : > { %790 = vrot.lane.b32.xlu1 %v783_v9, %s1880_s12  ;;  %v1608_v12 = vpop.f32.mrb[13].mxu0  ;;  %s2244_s12 = scalar_lea.hbm %s2302_s10, %s1541_s30 }
 0x43e   : > { %v786_v13 = vpop.f32.mrb[14].mxu0 }
 0x43f   : > { %v1609_v14 = vpop.f32.mrb[15].mxu0 }
 0x441   : > { %878 = vperm.xlu1 %1744, %v1783_v61  }
 0x445   : > { %1745 = vset.pattern.permute.xlu1 %v1879_v5 }
 0x446   : > { %v925_v15 = vpop.f32.mrb[16].mxu0 }
 0x447   : > { %932 = vrot.lane.b32.xlu1 %v925_v15, %s1881_s24  ;;  %v1620_v16 = vpop.f32.mrb[17].mxu0  ;;  %s419_s24 = sand.u32 1, %s1852_s14  }
 0x448   : > { %v928_v17 = vpop.f32.mrb[18].mxu0  ;;  %s1380_s16 = scalar_lea.sflag [#allocation7], %s419_s24 }
 0x449   : > { %v1621_v18 = vpop.f32.mrb[19].mxu0 }
 0x44b   : > { %1020 = vperm.xlu1 %1745, %v1785_v63   ;;  %v1766_v63 = vld [vmem:[%s2300_s8 + $0x20] sm:$0xff]  }
 0x44f   : > { %v1067_v19 = vpop.f32.mrb[20].mxu0  ;;  %1746 = vset.pattern.permute.xlu1 %v1876_v32  ;;  %v1759_v32 = vld [vmem:[%s2296_s4 + $0x8] sm:$0xff]  }
 0x450   : > { %1074 = vrot.lane.b32.xlu1 %v1067_v19, %s1882_s27  ;;  %v1632_v20 = vpop.f32.mrb[21].mxu0  ;;  %1637 = vmatpush3.bf16.msra.mxu1 %v1759_v32  ;;  %s1503_s27 = sshll.u32 %s419_s24, 3  ;;  %v1531_v19 = vld [vmem:[%s2301_s9] ss:$0 sm:$0xff] }
 0x451   : > { %v1070_v21 = vpop.f32.mrb[22].mxu0  ;;  %1650 = vmatprep.subr.bf16.mxu1 %v1870_v1  ;;  %s421_s11 = scalar_lea.vmem [#allocation6], %s1503_s27 }
 0x452   : > { %v1633_v22 = vpop.f32.mrb[23].mxu0  ;;  %s1394_s19 = sshll.u32 %s421_s11, 4  ;;  %s2246_s19 = int_to_ptr.vmem [resolvable:$true] %s1394_s19 }
 0x453   : > { %s1790_s27 = scalar_lea.vmem %s2246_s19, 128  ;;  %p1797_p1 = scmp.lt.s32.totalorder %s2246_s19, %s1795_s29 }
 0x454   : > { %1089 = vperm.xlu1 %1746, %v1787_v8   ;;  %p1791_p12 = scmp.ne.s32.totalorder %s2246_s19, %s1790_s27  ;;  %p1798_p2 = scmp.lt.s32.totalorder %s1796_s0, %s1790_s27 }
 0x456   : > { %p1792_p13 = pnand %p1791_p12, %p1979_p4  ;;  %p1799_p3 = por %p1798_p2, %p1797_p1 }
 0x458   : > { %1748 = vset.pattern.permute.xlu1 %v1878_v53  ;;  %v1760_v53 = vld [vmem:[%s2298_s6] sm:$0xff]   ;;  %p1793_p0 = pneg %p1792_p13 }
 0x459   : > { %1109 = vperm.xlu1 %1748, %v1787_v8   ;;  %1643 = vmatpush3.bf16.msra.mxu0 %v1760_v53 }
 0x45a   : > { %1644 = vmatprep.subr.bf16.mxu0 %v1870_v1  ;;  %p1800_p5 = pnand %p1799_p3, %p1793_p0 }
 0x45d   : > { %1749 = vset.pattern.permute.xlu1 %v1879_v5  ;;  %v734_v5 = vpop.permute.xlu1 %733  ;;  %1645 = vmatpush3.bf16.msra.mxu0 %v1761_v54 }
 0x45e   : > { %1119 = vperm.xlu1 %1749, %v1787_v8   ;;  %v736_v25 = vmul.f32 %v734_v5, %v730_v24 }
 0x4a1   : > { %v1100_v42 = vpop.permute.xlu0 %1099 }
 0x4af   : > { %v791_v26 = vpop.permute.xlu1 %790 }
 0x4b0   : > { %v793_v27 = vadd.f32 %v791_v26, %v736_v25 }
 0x4b2   : > { %795 = vst.msk [vmem:[#allocation5] sm:$0xff] %vm794_vm10, %v793_v27 }
 0x4b9   : > { %v875_v29 = vld [vmem:[#allocation5] sm:$0xff] }
 0x4c0   : > { %v879_v28 = vpop.permute.xlu1 %878 }
 0x4c1   : > { %v881_v30 = vmul.f32 %v879_v28, %v875_v29 }
 0x4c4   : > { %v933_v31 = vpop.permute.xlu1 %932 }
 0x4c5   : > { %v935_v33 = vadd.f32 %v933_v31, %v881_v30 }
 0x4c7   : > { %937 = vst.msk [vmem:[#allocation5] sm:$0xff] %vm936_vm11, %v935_v33 }
 0x4ca   : > { %v1021_v34 = vpop.permute.xlu1 %1020 }
 0x4ce   : > { %v1017_v35 = vld [vmem:[#allocation5] sm:$0xff]  ;;  %v1075_v37 = vpop.permute.xlu1 %1074 }
 0x4cf   : > { %v1023_v36 = vmul.f32 %v1021_v34, %v1017_v35 }
 0x4d1   : > { %v1077_v38 = vadd.f32 %v1075_v37, %v1023_v36 }
 0x4d3   : > { %1079 = vst.msk [vmem:[#allocation5] sm:$0xff] %vm1078_vm12, %v1077_v38  ;;  %v1090_v40 = vpop.permute.xlu1 %1089 }
 0x4d8   : > { %v1110_v46 = vpop.permute.xlu1 %1109 }
 0x4da   : > { %v1086_v39 = vld [vmem:[#allocation5] sm:$0xff] }
 0x4db   : > { %v1092_v41 = vmul.f32 %v1090_v40, %v1086_v39 }
 0x4dd   : > { %1093 = vst.msk [vmem:[#allocation5] sm:$0xff] %vm520_vm2, %v1092_v41  ;;  %v1120_v50 = vpop.permute.xlu1 %1119 }
 0x4e4   : > { %v1096_v43 = vld [vmem:[#allocation5] sm:$0xff] }
 0x4e5   : > { %v1102_v44 = vmul.f32 %v1100_v42, %v1096_v43 }
 0x4e7   : > { %1103 = vst.msk [vmem:[#allocation5] sm:$0xff] %vm794_vm10, %v1102_v44 }
 0x4ee   : > { %v1106_v45 = vld [vmem:[#allocation5] sm:$0xff] }
 0x4ef   : > { %v1112_v47 = vmul.f32 %v1110_v46, %v1106_v45 }
 0x4f1   : > { %1113 = vst.msk [vmem:[#allocation5] sm:$0xff] %vm936_vm11, %v1112_v47 }
 0x4f8   : > { %v1116_v49 = vld [vmem:[#allocation5] sm:$0xff] }
 0x4f9   : > { %v1122_v51 = vmul.f32 %v1120_v50, %v1116_v49 }
 0x4fb   : > { %1123 = vst.msk [vmem:[#allocation5] sm:$0xff] %vm1078_vm12, %v1122_v51 }
 0x502   : > { %v1124_v52 = vld [vmem:[#allocation5] sm:$0xff] }
 0x503   : > { %v1125_v48 = vpack.c.bf16 %v1124_v52, %v1124_v52 }
 0x505   : > { %1639 = vmatmul.mubr.msk.bf16.vlgmr.msra.gmra.mrb[12].mxu1 %vm465_vm1, %v1125_v48 }
 0x506   : > { %1666 = vmatprep.mubr.msk.bf16.mxu1 %vm1871_vm0, %v1870_v1  ;;  %1651 = vmatpush3.bf16.msra.mxu1 %v1762_v55 }
 0x507   : > { %1652 = vmatprep.subr.bf16.mxu1 %v1870_v1 }
 0x50a   : > { %1653 = vmatpush3.bf16.msra.mxu1 %v1763_v56 }
 0x50b   : > { %1654 = vmatprep.subr.bf16.mxu1 %v1870_v1 }
 0x50e   : > { %1655 = vmatpush3.bf16.msra.mxu1 %v1764_v57 }
 0x50f   : > { %1656 = vmatprep.subr.bf16.mxu1 %v1870_v1 }
 0x512   : > { %1657 = vmatpush3.bf16.msra.mxu1 %v1765_v62 }
 0x513   : > { %1658 = vmatprep.subr.bf16.mxu1 %v1870_v1 }
 0x516   : > { %1659 = vmatpush3.bf16.msra.mxu1 %v1766_v63 }
 0x517   : > { %1660 = vmatprep.subr.bf16.mxu1 %v1870_v1 }
 0x51a   : > { %1661 = vmatpush3.bf16.msra.mxu1 %v1767_v4 }
 0x51b   : > { %1662 = vmatprep.subr.bf16.mxu1 %v1870_v1 }
 0x51e   : > { %1663 = vmatpush3.bf16.msra.mxu1 %v1768_v7 }
 0x51f   : > { %1664 = vmatprep.subr.bf16.mxu1 %v1870_v1 }
 0x522   : > { %1665 = vmatpush3.bf16.msra.mxu1 %v1769_v10 }
 0x5d8   : > { %v1187_v59 = vpop.f32.mrb[12].mxu1 }
 0x5d9   : > { %v1188_v61 = vadd.f32 %v1523_v58, %v1187_v59  ;;  %v1640_v0 = vpop.f32.mrb[13].mxu1 }
 0x5da   : > { %v1190_v2 = vpop.f32.mrb[14].mxu1 }
 0x5db   : > { %v1193_v3 = vpack.c.bf16 %v1188_v61, %v1188_v61  ;;  %v1641_v60 = vpop.f32.mrb[15].mxu1 }
 0x5dd   : > { %1647 = vmatmul.mubr.msk.bf16.vlgmr.msra.gmra.mrb[24].mxu0 %vm465_vm1, %v1193_v3 }
 0x6b0   : > { %v1254_v6 = vpop.f32.mrb[24].mxu0 }
 0x6b1   : > { %v1255_v8 = vadd.f32 %v1527_v11, %v1254_v6  ;;  %v1648_v9 = vpop.f32.mrb[25].mxu0 }
 0x6b2   : > { %v1257_v12 = vpop.f32.mrb[26].mxu0 }
 0x6b3   : > { %v1261_v13 = vmul.f32 0.70710677, %v1255_v8  ;;  %v1649_v14 = vpop.f32.mrb[27].mxu0  ;;  %v1260_v1 = vmul.f32 0.5, %v1255_v8 }
 0x6b5   : > { %1788 = verf.f32 %v1261_v13 }
 0x6bf   : > { %v1789_v15 = vpop.eup %1788 }
 0x6c0   : > { %v1263_v16 = vadd.f32 1.0, %v1789_v15 }
 0x6c2   : > { %v1264_v17 = vmul.f32 %v1263_v16, %v1260_v1 }
 0x6c4   : > { %v1265_v18 = vpack.c.bf16 %v1264_v17, %v1264_v17 }
 0x6c6   : > { %1667 = vmatmul.mubr.bf16.vlgmr.msra.gmra.mrb[16].mxu1 %v1265_v18 }
 0x799   : > { %v1371_v20 = vpop.f32.mrb[16].mxu1 }
 0x79a   : > { %v1372_v21 = vadd.f32 %v1531_v19, %v1371_v20  ;;  %v1668_v22 = vpop.f32.mrb[17].mxu1 }
 0x79b   : > { %v1374_v23 = vpop.f32.mrb[18].mxu1 }
 0x79c   : > { %v1377_v32 = vadd.f32 %v1372_v21, %v1188_v61  ;;  %v1669_v53 = vpop.f32.mrb[19].mxu1 }
 0x79e   : > { %1378 = vst.msk [vmem:[%s421_s11] sm:$0xff] %vm465_vm1, %v1377_v32 }
 0x79f   : > { %1803 = shalt.err (!%p1800_p5)
}
 0x7a0   : > { %s1804_s24 = scalar_lea.hbm %s2244_s12, 128  ;;  %s1808_s20 = scalar_lea.hbm %s2302_s10, 256 }
 0x7a1   : > { %p1805_p6 = scmp.ne.s32.totalorder %s2244_s12, %s1804_s24  ;;  %p1809_p10 = scmp.lt.u32.totalorder %s2244_s12, %s2302_s10 }
 0x7a2   : > { %p1810_p11 = scmp.lt.u32.totalorder %s1808_s20, %s1804_s24  ;;  %p1812_p13 = scmp.lt.u32.totalorder %s1804_s24, %s2244_s12 }
 0x7a3   : > { %p1806_p7 = pnand %p1805_p6, %p1979_p4 }
 0x7a4   : > { %p1811_p12 = por %p1810_p11, %p1809_p10 }
 0x7a5   : > { %p1807_p9 = pneg %p1806_p7 }
 0x7a6   : > { %p1813_p0 = por %p1812_p13, %p1811_p12 }
 0x7a8   : > { %p1814_p1 = pnand %p1813_p0, %p1807_p9 }
 0x7aa   : > { %1817 = shalt.err (!%p1814_p1)
}
 0x7ab   : > { %1670 = dma.vmem_to_hbm [thread:$0]  (%p1979_p4), %s2246_s19, 128, %s2244_s12, %s1380_s16  }
 0x7ac PF: > { %p1676_p2 = scmp.ge.s32.totalorder %s1868_s18, 2  ;;  %s1406_s0 = sand.u32 1, %s1848_s13  }
 0x7ad   : > { %s1407_s27 = scalar_lea.sflag [#allocation7], %s1406_s0 }
 0x7ae   : > { %p1673_p3 = pnand %p1676_p2, %p1986_p8 }
 0x7b0   : > { %1843 = dma.done.wait (!%p1673_p3), %s1407_s27, 128  }
 0x7b1   : > { %1845 = vsyncadd (!%p1673_p3), %s1407_s27, 4294967168  ;;  %s23_s18 = sadd.s32 1, %s1868_s18   ;;  %s2307_s13 = smov %s1852_s14 }
 0x7b2   : > { %p20_p5 = scmp.ge.s32.totalorder %s23_s18, 4   ;;  %s2308_s14 = smov %s1856_s15 }
 0x7b3   : > { %s2309_s15 = smov %s1992_s26  ;;  %s2310_s16 = smov %s1864_s17 }
 0x7b4   : > { %s2311_s17 = smov %s2313_s21  ;;  %22 = sbr.rel (!%p20_p5) target bundleno = 6 (0x6), region = 109 }
 0x7bb   :  { %1412 = vsyncpa [#allocation7], 1 }
 0x7bc   :  { %1414 = vsyncpa [#allocation7 + $0x1], 1 }

// kernel: tpu_custom_call.1
= control target key start
LH: loop header
LB: loop body
LE: loop exit
PB: predicated region body
PF: predicated region fallthrough
CT: control target
= control target key end

     0   :  { %s2292_s0 = inlined_call_operand.vmem [shape: bf16[2,8,32], index: 0, kind: input, shape index: {}]   ;;  %s2293_s1 = inlined_call_operand.vmem [shape: bf16[2,8,32], index: 1, kind: input, shape index: {}]   ;;  %s2294_s2 = inlined_call_operand.vmem [shape: bf16[2,8,32], index: 2, kind: input, shape index: {}]   ;;  %s2295_s3 = inlined_call_operand.vmem [shape: bf16[32,32], index: 3, kind: input, shape index: {}]   ;;  %s2296_s4 = inlined_call_operand.vmem [shape: bf16[32,32], index: 4, kind: input, shape index: {}]   ;;  %s2297_s5 = inlined_call_operand.vmem [shape: f32[1,32], index: 5, kind: input, shape index: {}]   ;;  %s2298_s6 = inlined_call_operand.vmem [shape: bf16[32,128], index: 6, kind: input, shape index: {}]   ;;  %s2299_s7 = inlined_call_operand.vmem [shape: f32[1,128], index: 7, kind: input, shape index: {}]   ;;  %s2300_s8 = inlined_call_operand.vmem [shape: bf16[128,32], index: 8, kind: input, shape index: {}]   ;;  %s2301_s9 = inlined_call_operand.vmem [shape: f32[1,32], index: 9, kind: input, shape index: {}]   ;;  %s2302_s10 = inlined_call_operand.hbm [shape: f32[2,8,32], index: 10, kind: output, shape index: {}]  }
   0x1   :  { %2303 = sst [smem:[#allocation9_spill]] %s2292_s0 }
   0x2   :  { %15 = vsyncpa [#allocation7], 0 }
   0x3   :  { %17 = vsyncpa [#allocation7 + $0x1], 0  ;;  %s1939_s13 = smov 0   ;;  %s1941_s14 = smov 0  }
   0x4   :  { %s1943_s15 = smov 0   ;;  %s1945_s16 = smov 0  }
   0x5   :  { %s1947_s17 = smov 0   ;;  %s1949_s18 = smov 0  }
   0x6 LB: > { %s1498_s19 = sadd.s32 4294967295, %s1868_s18   ;;  %s1499_s20 = sadd.s32 4294967294, %s1868_s18   ;;  %s1868_s18 = sphi %s1949_s18, %s23_s18   ;;  %s1864_s17 = sphi %s1947_s17, %s2311_s17   ;;  %s1860_s16 = sphi %s1945_s16, %s2310_s16   ;;  %s1856_s15 = sphi %s1943_s15, %s2309_s15   ;;  %s1852_s14 = sphi %s1941_s14, %s2308_s14   ;;  %s1848_s13 = sphi %s1939_s13, %s2307_s13  }
   0x7   : > { %s42_s21 = sadd.s32 1, %s1864_s17  ;;  %s282_s22 = sadd.s32 1, %s1856_s15 }
   0x8   : > { %p44_p0 = scmp.ge.s32.totalorder %s42_s21, 2  ;;  %p292_p1 = scmp.ne.s32.totalorder %s1856_s15, %s1852_s14 }
   0x9   : > { %p293_p2 = scmp.eq.s32.totalorder %s1498_s19, 1  ;;  %p298_p3 = scmp.ne.s32.totalorder %s1852_s14, %s1848_s13 }
   0xa   : > { %s2313_s21 = smov (%p44_p0, %s42_s21), 0  ;;  %p299_p5 = scmp.eq.s32.totalorder %s1499_s20, 1 }
   0xb   : > { %p1979_p4 = por %p293_p2, %p292_p1  ;;  %s277_s24 = ssub.s32 %s1864_s17, %s2313_s21 }
   0xc   : > { %p1502_p6 = scmp.ge.s32.totalorder %s1868_s18, 1  ;;  %p280_p7 = scmp.eq.s32.totalorder %s277_s24, 0 }
   0xd   : > { %p1986_p8 = por %p299_p5, %p298_p3  ;;  %p368_p9 = scmp.lt.s32.totalorder %s1868_s18, 3 }
   0xe   : > { %s1992_s26 = scalar_select %p280_p7, %s1856_s15, %s282_s22  }
   0xf   : > { %p369_p10 = pnand %p1502_p6, %p368_p9 }
  0x10   : > { %v1751_v0 = vld [vmem:[%s2295_s3] sm:$0xff] (!%p369_p10)   ;;  %v1870_v1 = vmov (!%p369_p10), 0.0   ;;  %v1752_v2 = vld [vmem:[%s2295_s3 + $0x8] sm:$0xff] (!%p369_p10)   ;;  %vm1871_vm0 = vmmov (!%p369_p10), 0   ;;  %p422_p11 = scmp.lt.s32.totalorder (!%p369_p10), %s1860_s16, 1  ;;  %vm465_vm1 = vcmask (!%p369_p10), 261120  }
  0x11   : > { %372 = sbr.rel (%p369_p10) target bundleno = 1964 (0x7ac), region = 60  ;;  %1578 = vmatprep.subr.bf16.mxu0 (!%p369_p10), %v1870_v1  ;;  %1598 = vmatprep.subr.bf16.mxu1 (!%p369_p10), %v1870_v1  ;;  %516 = vst.msk [vmem:[#allocation5] sm:$0xff] (!%p369_p10), %vm465_vm1, %v1870_v1  ;;  %s2306_s0 = sld [smem:[#allocation9_spill]] (!%p369_p10)  ;;  %vm520_vm2 = vcmask (!%p369_p10), 64512   ;;  %vm511_vm3 = vcmask (!%p369_p10), 257024   ;;  %vm513_vm4 = vcmask (!%p369_p10), 31744  }
  0x12   : > { %1579 = vmatpush3.bf16.msra.mxu0 (!%p369_p10), %v1751_v0  ;;  %1582 = vmatprep.mubr.msk.bf16.mxu0 (!%p369_p10), %vm1871_vm0, %v1870_v1  ;;  %s1872_s29 = smov (!%p369_p10), 120   ;;  %s1873_s30 = smov (!%p369_p10), 112   ;;  %v1875_v31 = vmov (!%p369_p10), -inf   ;;  %515 = vst.msk [vmem:[#allocation4] sm:$0xff] (!%p369_p10), %vm513_vm4, %v1870_v1  ;;  %v1876_v32 = vmov (!%p369_p10), 0   ;;  %v1877_v48 = vmov (!%p369_p10), 1  }
  0x13   : > { %1580 = vmatprep.subr.bf16.mxu0 (!%p369_p10), %v1870_v1  ;;  %1600 = vmatprep.mubr.msk.bf16.mxu1 (!%p369_p10), %vm1871_vm0, %v1870_v1  ;;  %514 = vst.msk [vmem:[#allocation3] sm:$0xff] (!%p369_p10), %vm513_vm4, %v1875_v31  ;;  %vm589_vm5 = vcmask (!%p369_p10), 7168   ;;  %v1878_v53 = vmov (!%p369_p10), 2   ;;  %vm602_vm6 = vcmask (!%p369_p10), 1043456   ;;  %vm728_vm7 = vcmask (!%p369_p10), 15368   ;;  %s1881_s24 = smov (!%p369_p10), 16  }
  0x14   : > { %1738 = vset.pattern.permute.xlu1 (!%p369_p10), %v1876_v32  ;;  %1739 = vset.pattern.permute.xlu0 (!%p369_p10), %v1877_v48  ;;  %vm873_vm8 = vcmask (!%p369_p10), 23568   ;;  %vm1015_vm9 = vcmask (!%p369_p10), 31768   ;;  %s1882_s27 = smov (!%p369_p10), 24   ;;  %vm794_vm10 = vcmask (!%p369_p10), 130112   ;;  %vm936_vm11 = vcmask (!%p369_p10), 195712  }
  0x15   : > { %vm1078_vm12 = vcmask (!%p369_p10), 261312  }
  0x16   : > { %1581 = vmatpush3.bf16.msra.mxu0 (!%p369_p10), %v1752_v2 }
  0x17   : > { %1586 = vmatprep.subr.bf16.mxu0 (!%p369_p10), %v1870_v1 }
  0x18   : > { %s423_s11 = scalar_select %p422_p11, %s1860_s16, 1 }
  0x1a   : > { %s2011_s12 = sshll.u32 %s423_s11, 2  ;;  %s1874_s11 = smov 104   ;;  %v2070_v49 = vld [vmem:[#allocation3] sm:$0xff] }
  0x1b   : > { %s428_s22 = scalar_lea.vmem %s2306_s0, %s2011_s12  ;;  %s435_s28 = scalar_lea.vmem %s2293_s1, %s2011_s12 }
  0x1c   : > { %v448_v3 = vld [vmem:[%s428_s22] sm:$0xf]  ;;  %s442_s22 = scalar_lea.vmem %s2294_s2, %s2011_s12  ;;  %s1880_s12 = smov 8  }
  0x1d   : > { %1583 = vmatmul.mubr.msk.bf16.vlgmr.msra.gmra.mrb[0].mxu0 %vm465_vm1, %v448_v3  ;;  %v517_v4 = vld [vmem:[%s435_s28] sm:$0xf]  ;;  %s1883_s28 = smov [#allocation6]  }
  0x1e   : > { %1588 = vmatprep.mubr.msk.bf16.mxu0 %vm1871_vm0, %v1870_v1  ;;  %v1513_v5 = vcombine.low %v517_v4, %v517_v4  ;;  %v525_v6 = vsel %vm520_vm2, %v517_v4, 0  ;;  %v518_v54 = vld [vmem:[%s442_s22] sm:$0xf] }
  0x1f   : > { %1587 = vmatpush3.bf16.xpose.msra.mxu0 %v525_v6  ;;  %v604_v55 = vsel %vm602_vm6, %v518_v54, 0  ;;  %v1515_v2 = vcombine.low %v518_v54, %v518_v54 }
  0x20   : > { %658 = vrot.lane.b32.xlu0 %v1513_v5, %s1872_s29  ;;  %803 = vrot.lane.b32.xlu1 %v1513_v5, %s1873_s30 }
  0x21   : > { %1592 = vmatprep.subr.bf16.mxu0 %v1870_v1 }
  0x92   : > { %v659_v7 = vpop.permute.xlu0 %658  ;;  %v804_v19 = vpop.permute.xlu1 %803 }
  0x93   : > { %v664_v8 = vsel %vm520_vm2, %v659_v7, 0  ;;  %v809_v20 = vsel %vm520_vm2, %v804_v19, 0 }
  0x94   : > { %1599 = vmatpush3.bf16.xpose.msra.mxu1 %v664_v8 }
  0x95   : > { %1610 = vmatprep.subr.bf16.mxu1 %v1870_v1 }
  0xf0   : > { %v503_v9 = vpop.f32.mrb[0].mxu0 }
  0xf1   : > { %v509_v10 = vmul.f32 0.35355338, %v503_v9  ;;  %v1584_v11 = vpop.f32.mrb[1].mxu0 }
  0xf2   : > { %v506_v12 = vpop.f32.mrb[2].mxu0 }
  0xf3   : > { %v510_v13 = vpack.c.bf16 %v509_v10, %v509_v10  ;;  %v1585_v14 = vpop.f32.mrb[3].mxu0 }
  0xf5   : > { %512 = vst.msk [vmem:[#allocation2] sm:$0xf] %vm511_vm3, %v510_v13 }
  0xfc   : > { %v519_v15 = vld [vmem:[#allocation2] sm:$0xf] }
  0xfd   : > { %v1754_v16 = vld [vmem:[#allocation2] ss:$0 sps:$4 sm:$0xff]   ;;  %1589 = vmatmul.mubr.msk.bf16.vlgmr.msra.gmra.mrb[4].mxu0 %vm520_vm2, %v519_v15 }
  0xfe   : > { %v1755_v17 = vld [vmem:[#allocation2] ss:$0 sps:$4 sm:$0xff]   ;;  %801 = vrot.lane.b32.xlu1 %v1754_v16, %s1873_s30  ;;  %1594 = vmatprep.mubr.msk.bf16.mxu0 %vm1871_vm0, %v1870_v1 }
  0xff   : > { %653 = vrot.lane.b32.xlu0 %v1755_v17, %s1872_s29  ;;  %v1756_v18 = vld [vmem:[#allocation2] ss:$0 sps:$4 sm:$0xff]   ;;  %1593 = vmatpush3.bf16.msra.mxu0 %v604_v55 }
 0x100   : > { %1604 = vmatprep.subr.bf16.mxu0 %v1870_v1 }
 0x102   : > { %943 = vrot.lane.b32.xlu1 %v1756_v18, %s1874_s11 }
 0x103   : > { %945 = vrot.lane.b32.xlu0 %v1513_v5, %s1874_s11  ;;  %v1879_v5 = vmov 3  }
 0x170   : > { %v802_v24 = vpop.permute.xlu1 %801 }
 0x171   : > { %v654_v21 = vpop.permute.xlu0 %653 }
 0x172   : > { %1601 = vmatmul.mubr.msk.bf16.vlgmr.msra.gmra.mrb[0].mxu1 %vm520_vm2, %v654_v21 }
 0x173   : > { %1611 = vmatpush3.bf16.xpose.msra.mxu1 %v809_v20  ;;  %1612 = vmatprep.mubr.msk.bf16.mxu1 %vm1871_vm0, %v1870_v1 }
 0x174   : > { %1622 = vmatprep.subr.bf16.mxu1 %v1870_v1  ;;  %v944_v25 = vpop.permute.xlu1 %943 }
 0x175   : > { %v946_v22 = vpop.permute.xlu0 %945 }
 0x176   : > { %v951_v23 = vsel %vm520_vm2, %v946_v22, 0 }
 0x17a   : > { %1613 = vmatmul.mubr.msk.bf16.vlgmr.msra.gmra.mrb[4].mxu1 %vm520_vm2, %v802_v24 }
 0x17b   : > { %1623 = vmatpush3.bf16.xpose.msra.mxu1 %v951_v23  ;;  %1624 = vmatprep.mubr.msk.bf16.mxu1 %vm1871_vm0, %v1870_v1 }
 0x17c   : > { %1634 = vmatprep.subr.bf16.mxu1 %v1870_v1 }
 0x182   : > { %1625 = vmatmul.mubr.msk.bf16.vlgmr.msra.gmra.mrb[8].mxu1 %vm520_vm2, %v944_v25 }
 0x183   : > { %1638 = vmatprep.mubr.msk.bf16.mxu1 %vm1871_vm0, %v1870_v1 }
 0x1d0   : > { %v2051_v26 = vpop.f32.mrb[4].mxu0 }
 0x1d1   : > { %v1590_v27 = vpop.f32.mrb[5].mxu0  ;;  %v568_v28 = vsel %vm520_vm2, %v2051_v26, -inf }
 0x1d2   : > { %569 = vmax.xlane.f32.xlu0 %v568_v28  ;;  %v564_v29 = vpop.f32.mrb[6].mxu0 }
 0x1d3   : > { %v1591_v30 = vpop.f32.mrb[7].mxu0 }
 0x245   : > { %v2057_v33 = vpop.f32.mrb[0].mxu1 }
 0x246   : > { %v1602_v34 = vpop.f32.mrb[1].mxu1  ;;  %v707_v35 = vsel %vm520_vm2, %v2057_v33, -inf }
 0x247   : > { %708 = vmax.xlane.f32.xlu1 %v707_v35  ;;  %v703_v36 = vpop.f32.mrb[2].mxu1 }
 0x248   : > { %v1603_v37 = vpop.f32.mrb[3].mxu1 }
 0x24d   : > { %v2061_v38 = vpop.f32.mrb[4].mxu1 }
 0x24e   : > { %v1614_v39 = vpop.f32.mrb[5].mxu1  ;;  %v852_v40 = vsel %vm520_vm2, %v2061_v38, -inf }
 0x24f   : > { %v848_v41 = vpop.f32.mrb[6].mxu1  ;;  %853 = vmax.xlane.f32.xlu0 %v852_v40 }
 0x250   : > { %v1615_v42 = vpop.f32.mrb[7].mxu1 }
 0x251   : > { %v583_v42 = vld [vmem:[#allocation4] sm:$0xff] }
 0x255   : > { %v2065_v43 = vpop.f32.mrb[8].mxu1 }
 0x256   : > { %v1626_v44 = vpop.f32.mrb[9].mxu1  ;;  %v994_v45 = vsel %vm520_vm2, %v2065_v43, -inf }
 0x257   : > { %v990_v46 = vpop.f32.mrb[10].mxu1  ;;  %995 = vmax.xlane.f32.xlu0 %v994_v45 }
 0x258   : > { %v1627_v47 = vpop.f32.mrb[11].mxu1 }
 0x25f   : > { %v570_v50 = vpop.xlane.xlu0 %569 }
 0x260   : > { %v2073_v51 = vmax.f32 %v2070_v49, %v570_v50 }
 0x262   : > { %v572_v52 = vsub.f32 %v2070_v49, %v2073_v51  ;;  %648 = vst.msk [vmem:[#allocation3] sm:$0xff] %vm589_vm5, %v2073_v51  ;;  %577 = vperm.xlu1 %1738, %v2073_v51  }
 0x264   : > { %v573_v27 = vmul.f32 1.442695, %v572_v52 }
 0x266   : > { %1740 = vset.pattern.permute.xlu1 %v1878_v53 }
 0x269   : > { %v2087_v57 = vld [vmem:[#allocation3] sm:$0xff] }
 0x2d4   : > { %v709_v56 = vpop.xlane.xlu1 %708 }
 0x2d5   : > { %v2090_v58 = vmax.f32 %v2087_v57, %v709_v56  ;;  %v591_v56 = vld [vmem:[#allocation5] sm:$0xff] }
 0x2d7   : > { %v711_v59 = vsub.f32 %v2087_v57, %v2090_v58  ;;  %796 = vst.msk [vmem:[#allocation3] sm:$0xff] %vm728_vm7, %v2090_v58  ;;  %716 = vperm.xlu0 %1739, %v2090_v58  }
 0x2d9   : > { %v712_v40 = vmul.f32 1.442695, %v711_v59 }
 0x2db   : > { %1742 = vset.pattern.permute.xlu0 %v1876_v32 }
 0x2dc   : > { %v854_v61 = vpop.xlane.xlu0 %853 }
 0x2de   : > { %v2098_v60 = vld [vmem:[#allocation3] sm:$0xff] }
 0x2df   : > { %v2101_v62 = vmax.f32 %v2098_v60, %v854_v61 }
 0x2e1   : > { %v856_v63 = vsub.f32 %v2098_v60, %v2101_v62  ;;  %938 = vst.msk [vmem:[#allocation3] sm:$0xff] %vm873_vm8, %v2101_v62  ;;  %v578_v0 = vpop.permute.xlu1 %577  ;;  %861 = vperm.xlu1 %1740, %v2101_v62  }
 0x2e2   : > { %v580_v3 = vsub.f32 %v2051_v26, %v578_v0 }
 0x2e3   : > { %v857_v51 = vmul.f32 1.442695, %v856_v63 }
 0x2e4   : > { %v581_v4 = vmul.f32 1.442695, %v580_v3  ;;  %v996_v7 = vpop.xlane.xlu0 %995 }
 0x2e5   : > { %741 = vrot.lane.b32.xlu1 %v1515_v2, %s1872_s29  ;;  %s1794_s29 = sshll.u32 %s1883_s28, 4  ;;  %s1795_s29 = int_to_ptr.vmem [resolvable:$false] %s1794_s29 }
 0x2e6   : > { %1770 = vpow2.f32 %v581_v4  ;;  %1741 = vset.pattern.permute.xlu1 %v1879_v5  ;;  %s1796_s0 = scalar_lea.vmem %s1795_s29, 256 }
 0x2e8   : > { %v2111_v6 = vld [vmem:[#allocation3] sm:$0xff] }
 0x2e9   : > { %v2114_v8 = vmax.f32 %v2111_v6, %v996_v7 }
 0x2eb   : > { %v998_v9 = vsub.f32 %v2111_v6, %v2114_v8  ;;  %1080 = vst.msk [vmem:[#allocation3] sm:$0xff] %vm1015_vm9, %v2114_v8  ;;  %1003 = vperm.xlu1 %1741, %v2114_v8  }
 0x2ed   : > { %v999_v57 = vmul.f32 1.442695, %v998_v9 }
 0x2ef   : > { %883 = vrot.lane.b32.xlu1 %v1515_v2, %s1873_s30  ;;  %s1541_s30 = sshll.u32 %s1860_s16, 7 }
 0x2f0   : > { %v1771_v10 = vpop.eup %1770  ;;  %1743 = vset.pattern.permute.xlu1 %v1877_v48 }
 0x2f1   : > { %v598_v11 = vpack.c.bf16 %v1771_v10, %v1771_v10  ;;  %v585_v12 = vsel %vm520_vm2, %v1771_v10, 0.0 }
 0x2f3   : > { %1595 = vmatmul.mubr.msk.bf16.vlgmr.msra.gmra.mrb[8].mxu0 %vm520_vm2, %v598_v11  ;;  %1025 = vrot.lane.b32.xlu1 %v1515_v2, %s1874_s11 }
 0x2f4   : > { %1606 = vmatprep.mubr.msk.bf16.mxu0 %vm1871_vm0, %v1870_v1 }
 0x317   : > { %586 = vadd.xlane.f32.xlu1 %v585_v12 }
 0x356   : > { %v717_v13 = vpop.permute.xlu0 %716 }
 0x357   : > { %v719_v14 = vsub.f32 %v2057_v33, %v717_v13 }
 0x359   : > { %v720_v15 = vmul.f32 1.442695, %v719_v14 }
 0x35b   : > { %1772 = vpow2.f32 %v720_v15 }
 0x360   : > { %v862_v16 = vpop.permute.xlu1 %861 }
 0x361   : > { %v864_v17 = vsub.f32 %v2061_v38, %v862_v16 }
 0x363   : > { %v865_v18 = vmul.f32 1.442695, %v864_v17 }
 0x364   : > { %v742_v19 = vpop.permute.xlu1 %741 }
 0x365   : > { %v1773_v20 = vpop.eup %1772  ;;  %1774 = vpow2.f32 %v865_v18  ;;  %v747_v21 = vsel %vm602_vm6, %v742_v19, 0 }
 0x366   : > { %1605 = vmatpush3.bf16.msra.mxu0 %v747_v21  ;;  %v724_v22 = vsel %vm520_vm2, %v1773_v20, 0.0  ;;  %v737_v23 = vpack.c.bf16 %v1773_v20, %v1773_v20 }
 0x367   : > { %725 = vadd.xlane.f32.xlu0 %v724_v22  ;;  %1616 = vmatprep.subr.bf16.mxu0 %v1870_v1 }
 0x369   : > { %1607 = vmatmul.mubr.msk.bf16.vlgmr.msra.gmra.mrb[12].mxu0 %vm520_vm2, %v737_v23  ;;  %v1758_v23 = vld [vmem:[%s2296_s4] sm:$0xff]  }
 0x36a   : > { %v1004_v24 = vpop.permute.xlu1 %1003  ;;  %1618 = vmatprep.mubr.msk.bf16.mxu0 %vm1871_vm0, %v1870_v1  ;;  %1635 = vmatpush3.bf16.msra.mxu1 %v1758_v23 }
 0x36b   : > { %v1006_v25 = vsub.f32 %v2065_v43, %v1004_v24  ;;  %1636 = vmatprep.subr.bf16.mxu1 %v1870_v1 }
 0x36d   : > { %v1007_v26 = vmul.f32 1.442695, %v1006_v25 }
 0x36e   : > { %v884_v28 = vpop.permute.xlu1 %883 }
 0x36f   : > { %v1775_v29 = vpop.eup %1774  ;;  %1776 = vpow2.f32 %v1007_v26  ;;  %v889_v30 = vsel %vm602_vm6, %v884_v28, 0 }
 0x370   : > { %1617 = vmatpush3.bf16.msra.mxu0 %v889_v30  ;;  %v869_v31 = vsel %vm520_vm2, %v1775_v29, 0.0  ;;  %v882_v33 = vpack.c.bf16 %v1775_v29, %v1775_v29  ;;  %1778 = vpow2.f32 %v573_v27 }
 0x371   : > { %870 = vadd.xlane.f32.xlu1 %v869_v31  ;;  %1628 = vmatprep.subr.bf16.mxu0 %v1870_v1  ;;  %1780 = vpow2.f32 %v712_v40 }
 0x372   : > { %v1026_v34 = vpop.permute.xlu1 %1025  ;;  %1782 = vpow2.f32 %v857_v51 }
 0x373   : > { %1619 = vmatmul.mubr.msk.bf16.vlgmr.msra.gmra.mrb[16].mxu0 %vm520_vm2, %v882_v33  ;;  %v1031_v35 = vsel %vm602_vm6, %v1026_v34, 0  ;;  %1784 = vpow2.f32 %v999_v57  ;;  %v1764_v57 = vld [vmem:[%s2300_s8 + $0x10] sm:$0xff]  }
 0x374   : > { %1629 = vmatpush3.bf16.msra.mxu0 %v1031_v35  ;;  %1630 = vmatprep.mubr.msk.bf16.mxu0 %vm1871_vm0, %v1870_v1 }
 0x375   : > { %1642 = vmatprep.subr.bf16.mxu0 %v1870_v1 }
 0x379   : > { %v1777_v36 = vpop.eup %1776 }
 0x37a   : > { %v1011_v37 = vsel %vm520_vm2, %v1777_v36, 0.0  ;;  %v1024_v38 = vpack.c.bf16 %v1777_v36, %v1777_v36  ;;  %v1779_v39 = vpop.eup %1778 }
 0x37b   : > { %1012 = vadd.xlane.f32.xlu1 %v1011_v37  ;;  %v1781_v41 = vpop.eup %1780  ;;  %v584_v43 = vmul.f32 %v1779_v39, %v583_v42 }
 0x37c   : > { %1631 = vmatmul.mubr.msk.bf16.vlgmr.msra.gmra.mrb[20].mxu0 %vm520_vm2, %v1024_v38  ;;  %v1783_v61 = vpop.eup %1782 }
 0x37d   : > { %594 = vperm.xlu0 %1742, %v1779_v39   ;;  %1646 = vmatprep.mubr.msk.bf16.mxu0 %vm1871_vm0, %v1870_v1  ;;  %v1785_v63 = vpop.eup %1784 }
 0x381   : > { %1747 = vset.pattern.permute.xlu0 %v1877_v48 }
 0x38c   : > { %733 = vperm.xlu1 %1743, %v1781_v41  }
 0x390   : > { %1744 = vset.pattern.permute.xlu1 %v1878_v53 }
 0x3a4   : > { %v587_v44 = vpop.xlane.xlu1 %586 }
 0x3a5   : > { %v588_v45 = vadd.f32 %v587_v44, %v584_v43 }
 0x3a7   : > { %590 = vst.msk [vmem:[#allocation4] sm:$0xff] %vm589_vm5, %v588_v45 }
 0x3ae   : > { %v722_v52 = vld [vmem:[#allocation4] sm:$0xff] }
 0x3af   : > { %v723_v48 = vmul.f32 %v1781_v41, %v722_v52 }
 0x3c6   : > { %v640_v46 = vpop.f32.mrb[8].mxu0 }
 0x3c7   : > { %v1596_v47 = vpop.f32.mrb[9].mxu0 }
 0x3c8   : > { %v643_v49 = vpop.f32.mrb[10].mxu0 }
 0x3c9   : > { %v1597_v50 = vpop.f32.mrb[11].mxu0 }
 0x3f4   : > { %v726_v54 = vpop.xlane.xlu0 %725 }
 0x3f5   : > { %v727_v55 = vadd.f32 %v726_v54, %v723_v48  ;;  %v1761_v54 = vld [vmem:[%s2298_s6 + $0x8] sm:$0xff]  }
 0x3f7   : > { %729 = vst.msk [vmem:[#allocation4] sm:$0xff] %vm728_vm7, %v727_v55  ;;  %v1762_v55 = vld [vmem:[%s2300_s8] sm:$0xff]  }
 0x3fc   : > { %v595_v58 = vpop.permute.xlu0 %594 }
 0x3fd   : > { %v597_v59 = vmul.f32 %v595_v58, %v591_v56  ;;  %v1763_v56 = vld [vmem:[%s2300_s8 + $0x8] sm:$0xff]   ;;  %v1523_v58 = vld [vmem:[%s2297_s5] ss:$0 sm:$0xff] }
 0x3fe   : > { %v867_v0 = vld [vmem:[#allocation4] sm:$0xff]  ;;  %v871_v60 = vpop.xlane.xlu1 %870 }
 0x3ff   : > { %v646_v2 = vadd.f32 %v640_v46, %v597_v59  ;;  %v868_v3 = vmul.f32 %v1783_v61, %v867_v0 }
 0x401   : > { %647 = vst.msk [vmem:[#allocation5] sm:$0xff] %vm520_vm2, %v646_v2  ;;  %v872_v62 = vadd.f32 %v871_v60, %v868_v3 }
 0x403   : > { %874 = vst.msk [vmem:[#allocation4] sm:$0xff] %vm873_vm8, %v872_v62  ;;  %v1765_v62 = vld [vmem:[%s2300_s8 + $0x18] sm:$0xff]  }
 0x408   : > { %v1013_v10 = vpop.xlane.xlu1 %1012  ;;  %v730_v24 = vld [vmem:[#allocation5] sm:$0xff] }
 0x40a   : > { %v1009_v4 = vld [vmem:[#allocation4] sm:$0xff] }
 0x40b   : > { %v1010_v7 = vmul.f32 %v1785_v63, %v1009_v4  ;;  %v1767_v4 = vld [vmem:[%s2300_s8 + $0x28] sm:$0xff]  }
 0x40d   : > { %v1014_v11 = vadd.f32 %v1013_v10, %v1010_v7  ;;  %v1768_v7 = vld [vmem:[%s2300_s8 + $0x30] sm:$0xff]   ;;  %v1769_v10 = vld [vmem:[%s2300_s8 + $0x38] sm:$0xff]  }
 0x40f   : > { %1016 = vst.msk [vmem:[#allocation4] sm:$0xff] %vm1015_vm9, %v1014_v11  ;;  %v1527_v11 = vld [vmem:[%s2299_s7] ss:$0 sm:$0xff] }
 0x416   : > { %v1094_v6 = vld [vmem:[#allocation4] sm:$0xff] }
 0x417   : > { %1786 = vrcp.f32 %v1094_v6 }
 0x421   : > { %v1787_v8 = vpop.eup %1786 }
 0x422   : > { %1099 = vperm.xlu0 %1747, %v1787_v8  }
 0x426   : > { %1750 = vset.pattern.permute.xlu0 %v1879_v5 }
 0x43c   : > { %v783_v9 = vpop.f32.mrb[12].mxu0 }
 0x43d   : > { %790 = vrot.lane.b32.xlu1 %v783_v9, %s1880_s12  ;;  %v1608_v12 = vpop.f32.mrb[13].mxu0  ;;  %s2244_s12 = scalar_lea.hbm %s2302_s10, %s1541_s30 }
 0x43e   : > { %v786_v13 = vpop.f32.mrb[14].mxu0 }
 0x43f   : > { %v1609_v14 = vpop.f32.mrb[15].mxu0 }
 0x441   : > { %878 = vperm.xlu1 %1744, %v1783_v61  }
 0x445   : > { %1745 = vset.pattern.permute.xlu1 %v1879_v5 }
 0x446   : > { %v925_v15 = vpop.f32.mrb[16].mxu0 }
 0x447   : > { %932 = vrot.lane.b32.xlu1 %v925_v15, %s1881_s24  ;;  %v1620_v16 = vpop.f32.mrb[17].mxu0  ;;  %s419_s24 = sand.u32 1, %s1852_s14  }
 0x448   : > { %v928_v17 = vpop.f32.mrb[18].mxu0  ;;  %s1380_s16 = scalar_lea.sflag [#allocation7], %s419_s24 }
 0x449   : > { %v1621_v18 = vpop.f32.mrb[19].mxu0 }
 0x44b   : > { %1020 = vperm.xlu1 %1745, %v1785_v63   ;;  %v1766_v63 = vld [vmem:[%s2300_s8 + $0x20] sm:$0xff]  }
 0x44f   : > { %v1067_v19 = vpop.f32.mrb[20].mxu0  ;;  %1746 = vset.pattern.permute.xlu1 %v1876_v32  ;;  %v1759_v32 = vld [vmem:[%s2296_s4 + $0x8] sm:$0xff]  }
 0x450   : > { %1074 = vrot.lane.b32.xlu1 %v1067_v19, %s1882_s27  ;;  %v1632_v20 = vpop.f32.mrb[21].mxu0  ;;  %1637 = vmatpush3.bf16.msra.mxu1 %v1759_v32  ;;  %s1503_s27 = sshll.u32 %s419_s24, 3  ;;  %v1531_v19 = vld [vmem:[%s2301_s9] ss:$0 sm:$0xff] }
 0x451   : > { %v1070_v21 = vpop.f32.mrb[22].mxu0  ;;  %1650 = vmatprep.subr.bf16.mxu1 %v1870_v1  ;;  %s421_s11 = scalar_lea.vmem [#allocation6], %s1503_s27 }
 0x452   : > { %v1633_v22 = vpop.f32.mrb[23].mxu0  ;;  %s1394_s19 = sshll.u32 %s421_s11, 4  ;;  %s2246_s19 = int_to_ptr.vmem [resolvable:$true] %s1394_s19 }
 0x453   : > { %s1790_s27 = scalar_lea.vmem %s2246_s19, 128  ;;  %p1797_p1 = scmp.lt.s32.totalorder %s2246_s19, %s1795_s29 }
 0x454   : > { %1089 = vperm.xlu1 %1746, %v1787_v8   ;;  %p1791_p12 = scmp.ne.s32.totalorder %s2246_s19, %s1790_s27  ;;  %p1798_p2 = scmp.lt.s32.totalorder %s1796_s0, %s1790_s27 }
 0x456   : > { %p1792_p13 = pnand %p1791_p12, %p1979_p4  ;;  %p1799_p3 = por %p1798_p2, %p1797_p1 }
 0x458   : > { %1748 = vset.pattern.permute.xlu1 %v1878_v53  ;;  %v1760_v53 = vld [vmem:[%s2298_s6] sm:$0xff]   ;;  %p1793_p0 = pneg %p1792_p13 }
 0x459   : > { %1109 = vperm.xlu1 %1748, %v1787_v8   ;;  %1643 = vmatpush3.bf16.msra.mxu0 %v1760_v53 }
 0x45a   : > { %1644 = vmatprep.subr.bf16.mxu0 %v1870_v1  ;;  %p1800_p5 = pnand %p1799_p3, %p1793_p0 }
 0x45d   : > { %1749 = vset.pattern.permute.xlu1 %v1879_v5  ;;  %v734_v5 = vpop.permute.xlu1 %733  ;;  %1645 = vmatpush3.bf16.msra.mxu0 %v1761_v54 }
 0x45e   : > { %1119 = vperm.xlu1 %1749, %v1787_v8   ;;  %v736_v25 = vmul.f32 %v734_v5, %v730_v24 }
 0x4a1   : > { %v1100_v42 = vpop.permute.xlu0 %1099 }
 0x4af   : > { %v791_v26 = vpop.permute.xlu1 %790 }
 0x4b0   : > { %v793_v27 = vadd.f32 %v791_v26, %v736_v25 }
 0x4b2   : > { %795 = vst.msk [vmem:[#allocation5] sm:$0xff] %vm794_vm10, %v793_v27 }
 0x4b9   : > { %v875_v29 = vld [vmem:[#allocation5] sm:$0xff] }
 0x4c0   : > { %v879_v28 = vpop.permute.xlu1 %878 }
 0x4c1   : > { %v881_v30 = vmul.f32 %v879_v28, %v875_v29 }
 0x4c4   : > { %v933_v31 = vpop.permute.xlu1 %932 }
 0x4c5   : > { %v935_v33 = vadd.f32 %v933_v31, %v881_v30 }
 0x4c7   : > { %937 = vst.msk [vmem:[#allocation5] sm:$0xff] %vm936_vm11, %v935_v33 }
 0x4ca   : > { %v1021_v34 = vpop.permute.xlu1 %1020 }
 0x4ce   : > { %v1017_v35 = vld [vmem:[#allocation5] sm:$0xff]  ;;  %v1075_v37 = vpop.permute.xlu1 %1074 }
 0x4cf   : > { %v1023_v36 = vmul.f32 %v1021_v34, %v1017_v35 }
 0x4d1   : > { %v1077_v38 = vadd.f32 %v1075_v37, %v1023_v36 }
 0x4d3   : > { %1079 = vst.msk [vmem:[#allocation5] sm:$0xff] %vm1078_vm12, %v1077_v38  ;;  %v1090_v40 = vpop.permute.xlu1 %1089 }
 0x4d8   : > { %v1110_v46 = vpop.permute.xlu1 %1109 }
 0x4da   : > { %v1086_v39 = vld [vmem:[#allocation5] sm:$0xff] }
 0x4db   : > { %v1092_v41 = vmul.f32 %v1090_v40, %v1086_v39 }
 0x4dd   : > { %1093 = vst.msk [vmem:[#allocation5] sm:$0xff] %vm520_vm2, %v1092_v41  ;;  %v1120_v50 = vpop.permute.xlu1 %1119 }
 0x4e4   : > { %v1096_v43 = vld [vmem:[#allocation5] sm:$0xff] }
 0x4e5   : > { %v1102_v44 = vmul.f32 %v1100_v42, %v1096_v43 }
 0x4e7   : > { %1103 = vst.msk [vmem:[#allocation5] sm:$0xff] %vm794_vm10, %v1102_v44 }
 0x4ee   : > { %v1106_v45 = vld [vmem:[#allocation5] sm:$0xff] }
 0x4ef   : > { %v1112_v47 = vmul.f32 %v1110_v46, %v1106_v45 }
 0x4f1   : > { %1113 = vst.msk [vmem:[#allocation5] sm:$0xff] %vm936_vm11, %v1112_v47 }
 0x4f8   : > { %v1116_v49 = vld [vmem:[#allocation5] sm:$0xff] }
 0x4f9   : > { %v1122_v51 = vmul.f32 %v1120_v50, %v1116_v49 }
 0x4fb   : > { %1123 = vst.msk [vmem:[#allocation5] sm:$0xff] %vm1078_vm12, %v1122_v51 }
 0x502   : > { %v1124_v52 = vld [vmem:[#allocation5] sm:$0xff] }
 0x503   : > { %v1125_v48 = vpack.c.bf16 %v1124_v52, %v1124_v52 }
 0x505   : > { %1639 = vmatmul.mubr.msk.bf16.vlgmr.msra.gmra.mrb[12].mxu1 %vm465_vm1, %v1125_v48 }
 0x506   : > { %1666 = vmatprep.mubr.msk.bf16.mxu1 %vm1871_vm0, %v1870_v1  ;;  %1651 = vmatpush3.bf16.msra.mxu1 %v1762_v55 }
 0x507   : > { %1652 = vmatprep.subr.bf16.mxu1 %v1870_v1 }
 0x50a   : > { %1653 = vmatpush3.bf16.msra.mxu1 %v1763_v56 }
 0x50b   : > { %1654 = vmatprep.subr.bf16.mxu1 %v1870_v1 }
 0x50e   : > { %1655 = vmatpush3.bf16.msra.mxu1 %v1764_v57 }
 0x50f   : > { %1656 = vmatprep.subr.bf16.mxu1 %v1870_v1 }
 0x512   : > { %1657 = vmatpush3.bf16.msra.mxu1 %v1765_v62 }
 0x513   : > { %1658 = vmatprep.subr.bf16.mxu1 %v1870_v1 }
 0x516   : > { %1659 = vmatpush3.bf16.msra.mxu1 %v1766_v63 }
 0x517   : > { %1660 = vmatprep.subr.bf16.mxu1 %v1870_v1 }
 0x51a   : > { %1661 = vmatpush3.bf16.msra.mxu1 %v1767_v4 }
 0x51b   : > { %1662 = vmatprep.subr.bf16.mxu1 %v1870_v1 }
 0x51e   : > { %1663 = vmatpush3.bf16.msra.mxu1 %v1768_v7 }
 0x51f   : > { %1664 = vmatprep.subr.bf16.mxu1 %v1870_v1 }
 0x522   : > { %1665 = vmatpush3.bf16.msra.mxu1 %v1769_v10 }
 0x5d8   : > { %v1187_v59 = vpop.f32.mrb[12].mxu1 }
 0x5d9   : > { %v1188_v61 = vadd.f32 %v1523_v58, %v1187_v59  ;;  %v1640_v0 = vpop.f32.mrb[13].mxu1 }
 0x5da   : > { %v1190_v2 = vpop.f32.mrb[14].mxu1 }
 0x5db   : > { %v1193_v3 = vpack.c.bf16 %v1188_v61, %v1188_v61  ;;  %v1641_v60 = vpop.f32.mrb[15].mxu1 }
 0x5dd   : > { %1647 = vmatmul.mubr.msk.bf16.vlgmr.msra.gmra.mrb[24].mxu0 %vm465_vm1, %v1193_v3 }
 0x6b0   : > { %v1254_v6 = vpop.f32.mrb[24].mxu0 }
 0x6b1   : > { %v1255_v8 = vadd.f32 %v1527_v11, %v1254_v6  ;;  %v1648_v9 = vpop.f32.mrb[25].mxu0 }
 0x6b2   : > { %v1257_v12 = vpop.f32.mrb[26].mxu0 }
 0x6b3   : > { %v1261_v13 = vmul.f32 0.70710677, %v1255_v8  ;;  %v1649_v14 = vpop.f32.mrb[27].mxu0  ;;  %v1260_v1 = vmul.f32 0.5, %v1255_v8 }
 0x6b5   : > { %1788 = verf.f32 %v1261_v13 }
 0x6bf   : > { %v1789_v15 = vpop.eup %1788 }
 0x6c0   : > { %v1263_v16 = vadd.f32 1.0, %v1789_v15 }
 0x6c2   : > { %v1264_v17 = vmul.f32 %v1263_v16, %v1260_v1 }
 0x6c4   : > { %v1265_v18 = vpack.c.bf16 %v1264_v17, %v1264_v17 }
 0x6c6   : > { %1667 = vmatmul.mubr.bf16.vlgmr.msra.gmra.mrb[16].mxu1 %v1265_v18 }
 0x799   : > { %v1371_v20 = vpop.f32.mrb[16].mxu1 }
 0x79a   : > { %v1372_v21 = vadd.f32 %v1531_v19, %v1371_v20  ;;  %v1668_v22 = vpop.f32.mrb[17].mxu1 }
 0x79b   : > { %v1374_v23 = vpop.f32.mrb[18].mxu1 }
 0x79c   : > { %v1377_v32 = vadd.f32 %v1372_v21, %v1188_v61  ;;  %v1669_v53 = vpop.f32.mrb[19].mxu1 }
 0x79e   : > { %1378 = vst.msk [vmem:[%s421_s11] sm:$0xff] %vm465_vm1, %v1377_v32 }
 0x79f   : > { %1803 = shalt.err (!%p1800_p5)
}
 0x7a0   : > { %s1804_s24 = scalar_lea.hbm %s2244_s12, 128  ;;  %s1808_s20 = scalar_lea.hbm %s2302_s10, 256 }
 0x7a1   : > { %p1805_p6 = scmp.ne.s32.totalorder %s2244_s12, %s1804_s24  ;;  %p1809_p10 = scmp.lt.u32.totalorder %s2244_s12, %s2302_s10 }
 0x7a2   : > { %p1810_p11 = scmp.lt.u32.totalorder %s1808_s20, %s1804_s24  ;;  %p1812_p13 = scmp.lt.u32.totalorder %s1804_s24, %s2244_s12 }
 0x7a3   : > { %p1806_p7 = pnand %p1805_p6, %p1979_p4 }
 0x7a4   : > { %p1811_p12 = por %p1810_p11, %p1809_p10 }
 0x7a5   : > { %p1807_p9 = pneg %p1806_p7 }
 0x7a6   : > { %p1813_p0 = por %p1812_p13, %p1811_p12 }
 0x7a8   : > { %p1814_p1 = pnand %p1813_p0, %p1807_p9 }
 0x7aa   : > { %1817 = shalt.err (!%p1814_p1)
}
 0x7ab   : > { %1670 = dma.vmem_to_hbm [thread:$0]  (%p1979_p4), %s2246_s19, 128, %s2244_s12, %s1380_s16  }
 0x7ac PF: > { %p1676_p2 = scmp.ge.s32.totalorder %s1868_s18, 2  ;;  %s1406_s0 = sand.u32 1, %s1848_s13  }
 0x7ad   : > { %s1407_s27 = scalar_lea.sflag [#allocation7], %s1406_s0 }
 0x7ae   : > { %p1673_p3 = pnand %p1676_p2, %p1986_p8 }
 0x7b0   : > { %1843 = dma.done.wait (!%p1673_p3), %s1407_s27, 128  }
 0x7b1   : > { %1845 = vsyncadd (!%p1673_p3), %s1407_s27, 4294967168  ;;  %s23_s18 = sadd.s32 1, %s1868_s18   ;;  %s2307_s13 = smov %s1852_s14 }
 0x7b2   : > { %p20_p5 = scmp.ge.s32.totalorder %s23_s18, 4   ;;  %s2308_s14 = smov %s1856_s15 }
 0x7b3   : > { %s2309_s15 = smov %s1992_s26  ;;  %s2310_s16 = smov %s1864_s17 }
 0x7b4   : > { %s2311_s17 = smov %s2313_s21  ;;  %22 = sbr.rel (!%p20_p5) target bundleno = 6 (0x6), region = 109 }
 0x7bb   :  { %1412 = vsyncpa [#allocation7], 1 }
 0x7bc   :  { %1414 = vsyncpa [#allocation7 + $0x1], 1 }

</bundles_post_ra>
